<compile_context>
chip_gen: v7x
topology: tpu7x:2x2x1
jax: 0.10.0
libtpu: 0.0.40
codegen_flags: <defaults>
</compile_context>

<pallas_src>
import functools

import jax
import jax.numpy as jnp
from jax.experimental import pallas as pl
from jax.experimental.pallas import tpu as pltpu

HIDDEN_DIM = 256
NUM_CLASSES = 2
IMG_FEAT_DIM = 2048            # resnet50 pooled feature dim
TXT_FEAT_DIM = 768             # roberta-base hidden size
PATCH = 4
VOCAB = 100

K_RAW = 3 * PATCH * PATCH      # 48 (im2col contraction depth)
K_AUG = K_RAW + 1              # +1 constant-1 lane folding conv_b into the matmul
FEAT_TILE = 1024               # conv feature tile -> 2 parallel tiles of 2048
CLS_PAD = 128                  # lane-dense classifier output width
CONV_BATCH_TILE = 8            # batch tile of the conv main loop
MAX_HEAD_BATCH_TILE = 128      # big-M batch tile for the fused head matmuls
CONV_ROW_CAP = 512             # CONV_BATCH_TILE * tile_p cap -> y stays ~2 MiB f32
VMEM_LIMIT = 32 * 1024 * 1024  # safe scoped-VMEM limit on v5e / v6e / v7x


def _round_up(x, m):
    return ((x + m - 1) // m) * m


def _conv_patch_tiling(n_patches):
    """Return (tile_p, padded n_patches). tile_p is a multiple of 8 and keeps
    CONV_BATCH_TILE * tile_p <= CONV_ROW_CAP; padded patch rows contribute 0."""
    cap = max(8, CONV_ROW_CAP // CONV_BATCH_TILE)
    np_pad = _round_up(n_patches, 8)
    for t in range(min(cap, np_pad), 7, -8):
        if np_pad % t == 0:
            return t, np_pad
    return 8, np_pad  # unreachable (8 divides np_pad); kept as a safe fallback


# ----------------------------- Pallas kernels ------------------------------

def conv_pool_kernel(patches_ref, w_ref, out_ref, acc_ref, *, inv_n):
    """Image backbone proxy: streamed relu(patches @ W) + global-average pool.

    conv_b rides in the last row of w_ref (patches carry a constant-1 lane),
    so the inner loop is matmul + ReLU + pooled-sum only.  Zero-padded patch
    rows have a 0 in the ones-lane and therefore contribute exactly 0.
    """
    p = pl.program_id(2)

    @pl.when(p == 0)
    def _init():
        acc_ref[...] = jnp.zeros_like(acc_ref)

    tb, tp, k = patches_ref.shape
    x = patches_ref[...].reshape(tb * tp, k)                            # bf16
    y = jnp.dot(x, w_ref[...], preferred_element_type=jnp.float32)      # MXU
    y = jnp.maximum(y, 0.0)                                             # ReLU
    acc_ref[...] += jnp.sum(y.reshape(tb, tp, -1), axis=1)              # pool sum

    @pl.when(p == pl.num_programs(2) - 1)
    def _finalize():
        out_ref[...] = acc_ref[...] * inv_n                             # avg pool


def head_kernel(img_ref, emb_ref, ew_ref, eb_ref, wi_ref, bi_ref,
                wt_ref, bt_ref, wci_ref, wct_ref, bc_ref, out_ref):
    """Text backbone proxy + full trainable head, at a large batch tile.

    emb already carries the masked-mean weights (folded in the wrapper):
      txt_feat = tanh(sum_s emb @ We + be)
      img_p    = pooled_img @ Wi + bi
      txt_p    = txt_feat   @ Wt + bt
      logits   = img_p @ Wc_img + txt_p @ Wc_txt + bc   (lane-padded to 128)
    which equals classifier(cat([img_p, txt_p])) of the PyTorch module.
    """
    txt_pool = jnp.sum(emb_ref[...].astype(jnp.float32), axis=1)        # (BT, 768)
    txt_feat = jnp.tanh(
        jnp.dot(txt_pool.astype(jnp.bfloat16), ew_ref[...],
                preferred_element_type=jnp.float32) + eb_ref[...])
    img_p = jnp.dot(img_ref[...].astype(jnp.bfloat16), wi_ref[...],
                    preferred_element_type=jnp.float32) + bi_ref[...]
    txt_p = jnp.dot(txt_feat.astype(jnp.bfloat16), wt_ref[...],
                    preferred_element_type=jnp.float32) + bt_ref[...]
    out_ref[...] = (jnp.dot(img_p.astype(jnp.bfloat16), wci_ref[...],
                            preferred_element_type=jnp.float32)
                    + jnp.dot(txt_p.astype(jnp.bfloat16), wct_ref[...],
                              preferred_element_type=jnp.float32)
                    + bc_ref[...])


# ------------------------------ pallas_call wrappers ------------------------

def conv_pool(patches, conv_w_aug, *, n_patches, tile_p):
    bp, np_pad, k_aug = patches.shape
    grid = (bp // CONV_BATCH_TILE, IMG_FEAT_DIM // FEAT_TILE, np_pad // tile_p)
    kernel = functools.partial(conv_pool_kernel, inv_n=1.0 / float(n_patches))
    # NOTE: the weight block is constant across the grid; double-buffering it
    # costs <0.5 MiB here so pipeline_mode tuning is intentionally skipped.
    return pl.pallas_call(
        kernel,
        out_shape=jax.ShapeDtypeStruct((bp, IMG_FEAT_DIM), jnp.float32),
        grid_spec=pltpu.PrefetchScalarGridSpec(
            num_scalar_prefetch=0,
            grid=grid,
            in_specs=[
                pl.BlockSpec((CONV_BATCH_TILE, tile_p, k_aug),
                             lambda b, f, p: (b, p, 0)),
                pl.BlockSpec((k_aug, FEAT_TILE), lambda b, f, p: (0, f)),
            ],
            out_specs=pl.BlockSpec((CONV_BATCH_TILE, FEAT_TILE),
                                   lambda b, f, p: (b, f)),
            scratch_shapes=[pltpu.VMEM((CONV_BATCH_TILE, FEAT_TILE), jnp.float32)],
        ),
        compiler_params=pltpu.CompilerParams(
            dimension_semantics=("parallel", "parallel", "arbitrary"),
            vmem_limit_bytes=VMEM_LIMIT,
        ),
    )(patches, conv_w_aug)


def fused_head(img_pooled, emb, enc_w, enc_b, wi, bi, wt, bt, wci, wct, bc,
               *, batch_tile):
    bp, s, d = emb.shape
    grid = (bp // batch_tile,)
    return pl.pallas_call(
        head_kernel,
        out_shape=jax.ShapeDtypeStruct((bp, CLS_PAD), jnp.float32),
        grid_spec=pltpu.PrefetchScalarGridSpec(
            num_scalar_prefetch=0,
            grid=grid,
            in_specs=[
                pl.BlockSpec((batch_tile, IMG_FEAT_DIM), lambda b: (b, 0)),
                pl.BlockSpec((batch_tile, s, d), lambda b: (b, 0, 0)),
                pl.BlockSpec((TXT_FEAT_DIM, TXT_FEAT_DIM), lambda b: (0, 0)),
                pl.BlockSpec((1, TXT_FEAT_DIM), lambda b: (0, 0)),
                pl.BlockSpec((IMG_FEAT_DIM, HIDDEN_DIM), lambda b: (0, 0)),
                pl.BlockSpec((1, HIDDEN_DIM), lambda b: (0, 0)),
                pl.BlockSpec((TXT_FEAT_DIM, HIDDEN_DIM), lambda b: (0, 0)),
                pl.BlockSpec((1, HIDDEN_DIM), lambda b: (0, 0)),
                pl.BlockSpec((HIDDEN_DIM, CLS_PAD), lambda b: (0, 0)),
                pl.BlockSpec((HIDDEN_DIM, CLS_PAD), lambda b: (0, 0)),
                pl.BlockSpec((1, CLS_PAD), lambda b: (0, 0)),
            ],
            out_specs=pl.BlockSpec((batch_tile, CLS_PAD), lambda b: (b, 0)),
        ),
        compiler_params=pltpu.CompilerParams(
            dimension_semantics=("parallel",),
            vmem_limit_bytes=VMEM_LIMIT,
        ),
    )(img_pooled, emb, enc_w, enc_b, wi, bi, wt, bt, wci, wct, bc)


# ------------------------------ model ---------------------------------------

def init_params(key):
    ks = jax.random.split(key, 9)
    s = 0.02
    return {
        # image backbone proxy (frozen) -- natural K (no lane padding)
        "conv_w": (jax.random.normal(ks[0], (K_RAW, IMG_FEAT_DIM), jnp.float32)
                   * s).astype(jnp.bfloat16),
        "conv_b": jnp.zeros((1, IMG_FEAT_DIM), jnp.float32),
        # text backbone proxy (frozen)
        "tok_emb": jax.random.normal(ks[1], (VOCAB, TXT_FEAT_DIM), jnp.float32) * s,
        "enc_w": (jax.random.normal(ks[2], (TXT_FEAT_DIM, TXT_FEAT_DIM),
                                    jnp.float32) * s).astype(jnp.bfloat16),
        "enc_b": jnp.zeros((1, TXT_FEAT_DIM), jnp.float32),
        # trainable head (exact module semantics; bf16 matmul weights)
        "img_proj_w": (jax.random.normal(ks[3], (IMG_FEAT_DIM, HIDDEN_DIM),
                                         jnp.float32) * s).astype(jnp.bfloat16),
        "img_proj_b": jax.random.normal(ks[4], (1, HIDDEN_DIM), jnp.float32) * s,
        "txt_proj_w": (jax.random.normal(ks[5], (TXT_FEAT_DIM, HIDDEN_DIM),
                                         jnp.float32) * s).astype(jnp.bfloat16),
        "txt_proj_b": jax.random.normal(ks[6], (1, HIDDEN_DIM), jnp.float32) * s,
        "cls_w": (jax.random.normal(ks[7], (2 * HIDDEN_DIM, NUM_CLASSES),
                                    jnp.float32) * s).astype(jnp.bfloat16),
        "cls_b": jax.random.normal(ks[8], (1, NUM_CLASSES), jnp.float32) * s,
    }


def forward(params, pixel_values, input_ids, attention_mask, labels=None):
    B, C, H, W = pixel_values.shape
    assert C * PATCH * PATCH == K_RAW, "conv_w stored for 3-channel PATCHxPATCH stem"
    hp, wp = H // PATCH, W // PATCH
    n_patches = hp * wp
    tile_p, np_pad = _conv_patch_tiling(n_patches)

    # batch padding: multiple of 8; if large, multiple of the 128-row head tile
    bp = _round_up(B, CONV_BATCH_TILE)
    if bp > MAX_HEAD_BATCH_TILE:
        bp = _round_up(bp, MAX_HEAD_BATCH_TILE)
    head_bt = min(MAX_HEAD_BATCH_TILE, bp)

    # --- image path glue: im2col + ones-lane (bias fold) + pads, cast bf16 ---
    patches = pixel_values.reshape(B, C, hp, PATCH, wp, PATCH)
    patches = patches.transpose(0, 2, 4, 1, 3, 5).reshape(B, n_patches, K_RAW)
    patches = jnp.concatenate(
        [patches, jnp.ones((B, n_patches, 1), patches.dtype)], axis=-1)   # K=49
    patches = jnp.pad(patches, ((0, bp - B), (0, np_pad - n_patches), (0, 0)))
    patches = patches.astype(jnp.bfloat16)
    conv_w_aug = jnp.concatenate(
        [params["conv_w"], params["conv_b"].astype(jnp.bfloat16)], axis=0)  # (49, 2048)

    # conv stem + ReLU + global-average pool  ->  (bp, 2048) f32
    img_pooled = conv_pool(patches, conv_w_aug, n_patches=n_patches, tile_p=tile_p)

    # --- text path glue: embedding gather, fold masked-mean weights, pad ---
    mask_f = attention_mask.astype(jnp.float32)
    denom = jnp.maximum(jnp.sum(mask_f, axis=1, keepdims=True), 1.0)
    weights = (mask_f / denom)[:, :, None]                               # (B, S, 1)
    emb = jnp.take(params["tok_emb"], input_ids, axis=0) * weights       # (B, S, 768)
    emb = jnp.pad(emb, ((0, bp - B), (0, 0), (0, 0))).astype(jnp.bfloat16)

    # lane-dense padded classifier weights, split into image / text halves
    # (torch.cat([img_proj, txt_proj]) @ Wc == img_proj @ Wc_top + txt_proj @ Wc_bot)
    wc_pad = jnp.zeros((2 * HIDDEN_DIM, CLS_PAD), jnp.bfloat16)
    wc_pad = wc_pad.at[:, :NUM_CLASSES].set(params["cls_w"])
    bc_pad = jnp.zeros((1, CLS_PAD), jnp.float32)
    bc_pad = bc_pad.at[:, :NUM_CLASSES].set(params["cls_b"])

    # text proxy + img_proj + txt_proj + classifier (both halves) + bias
    logits_pad = fused_head(
        img_pooled, emb, params["enc_w"], params["enc_b"],
        params["img_proj_w"], params["img_proj_b"],
        params["txt_proj_w"], params["txt_proj_b"],
        wc_pad[:HIDDEN_DIM], wc_pad[HIDDEN_DIM:], bc_pad,
        batch_tile=head_bt)

    logits = logits_pad[:B, :NUM_CLASSES]
    output = {"logits": logits}
    if labels is not None:
        logp = jax.nn.log_softmax(logits, axis=-1)
        nll = -jnp.take_along_axis(logp, labels[:, None], axis=1)[:, 0]
        output["loss"] = jnp.mean(nll)                  # nn.CrossEntropyLoss (mean)
    return output


if __name__ == "__main__":
    key = jax.random.PRNGKey(0)
    k_param, k_px, k_ids, k_lbl = jax.random.split(key, 4)

    params = init_params(k_param)

    B, S = 2, 8
    pixel_values = jax.random.normal(k_px, (B, 3, 16, 16), jnp.float32)
    input_ids = jax.random.randint(k_ids, (B, S), 0, VOCAB, jnp.int32)
    attention_mask = jnp.array([[1, 1, 1, 1, 1, 0, 0, 0],
                                [1, 1, 1, 1, 1, 1, 1, 1]], jnp.int32)
    labels = jax.random.randint(k_lbl, (B,), 0, NUM_CLASSES, jnp.int32)

    out = forward(params, pixel_values, input_ids, attention_mask, labels)
    jax.block_until_ready(out["logits"])
    jax.block_until_ready(out["loss"])
    assert out["logits"].shape == (B, NUM_CLASSES)
    print("KERNEL_OK")
</pallas_src>

<mosaic_0001>
module attributes {stable_mosaic.version = 11 : i64} {
  func.func @conv_pool_kernel(%arg0: i32, %arg1: i32, %arg2: i32, %arg3: memref<8x16x49xbf16, #tpu.memory_space<vmem>>, %arg4: memref<49x1024xbf16, #tpu.memory_space<vmem>>, %arg5: memref<8x1024xf32, #tpu.memory_space<vmem>>, %arg6: memref<8x1024xf32, #tpu.memory_space<vmem>>) attributes {dimension_semantics = [#tpu.dimension_semantics<parallel>, #tpu.dimension_semantics<parallel>, #tpu.dimension_semantics<arbitrary>], iteration_bounds = array<i64: 1, 2, 1>, scalar_prefetch = 0 : i64, scratch_operands = 1 : i64, tpu.core_type = #tpu.core_type<tc>, window_params = [{transform_indices = @transform_0, window_bounds = array<i64: 8, 16, 49>}, {transform_indices = @transform_1, window_bounds = array<i64: 49, 1024>}, {transform_indices = @transform_2, window_bounds = array<i64: 8, 1024>}]} {
    %c0_i32 = arith.constant 0 : i32
    %0 = arith.cmpi eq, %arg2, %c0_i32 : i32
    %1 = arith.extui %0 : i1 to i32
    %c0_i32_0 = arith.constant 0 : i32
    %2 = arith.cmpi ne, %1, %c0_i32_0 : i32
    scf.if %2 {
      %cst_13 = arith.constant 0.000000e+00 : f32
      %17 = vector.broadcast %cst_13 : f32 to vector<8x1024xf32>
      %c0_14 = arith.constant 0 : index
      %c0_15 = arith.constant 0 : index
      %18 = vector.load %arg6[%c0_14, %c0_15] : memref<8x1024xf32, #tpu.memory_space<vmem>>, vector<8x1024xf32>
      tpu.vector_store %arg6[%c0_14, %c0_15], %17 {strides = array<i32>} : memref<8x1024xf32, #tpu.memory_space<vmem>>, vector<8x1024xf32>,
    } else {
    }
    %c0 = arith.constant 0 : index
    %c0_1 = arith.constant 0 : index
    %c0_2 = arith.constant 0 : index
    %3 = vector.load %arg3[%c0, %c0_1, %c0_2] : memref<8x16x49xbf16, #tpu.memory_space<vmem>>, vector<8x16x49xbf16>
    %4 = vector.shape_cast %3 : vector<8x16x49xbf16> to vector<128x49xbf16>
    %c0_3 = arith.constant 0 : index
    %c0_4 = arith.constant 0 : index
    %5 = vector.load %arg4[%c0_3, %c0_4] : memref<49x1024xbf16, #tpu.memory_space<vmem>>, vector<49x1024xbf16>
    %cst = arith.constant dense<0.000000e+00> : vector<128x1024xf32>
    %6 = tpu.matmul %4, %5, %cst {dimension_numbers = #tpu.dot_dimension_numbers<[1], [0], [0], [1], [0, 0, 1, 1], [], []>} : vector<128x49xbf16>, vector<49x1024xbf16>, vector<128x1024xf32> -> vector<128x1024xf32>
    %cst_5 = arith.constant 0.000000e+00 : f32
    %7 = vector.broadcast %cst_5 : f32 to vector<128x1024xf32>
    %8 = arith.maximumf %6, %7 : vector<128x1024xf32>
    %c0_6 = arith.constant 0 : index
    %c0_7 = arith.constant 0 : index
    %9 = vector.load %arg6[%c0_6, %c0_7] : memref<8x1024xf32, #tpu.memory_space<vmem>>, vector<8x1024xf32>
    %10 = vector.shape_cast %8 : vector<128x1024xf32> to vector<8x16x1024xf32>
    %cst_8 = arith.constant dense<0.000000e+00> : vector<8x1024xf32>
    %11 = vector.multi_reduction <add>, %10, %cst_8 [1] : vector<8x16x1024xf32> to vector<8x1024xf32>
    %12 = arith.addf %9, %11 : vector<8x1024xf32>
    %c0_9 = arith.constant 0 : index
    %c0_10 = arith.constant 0 : index
    %13 = vector.load %arg6[%c0_9, %c0_10] : memref<8x1024xf32, #tpu.memory_space<vmem>>, vector<8x1024xf32>
    tpu.vector_store %arg6[%c0_9, %c0_10], %12 {strides = array<i32>} : memref<8x1024xf32, #tpu.memory_space<vmem>>, vector<8x1024xf32>,
    %c0_i32_11 = arith.constant 0 : i32
    %14 = arith.cmpi eq, %arg2, %c0_i32_11 : i32
    %15 = arith.extui %14 : i1 to i32
    %c0_i32_12 = arith.constant 0 : i32
    %16 = arith.cmpi ne, %15, %c0_i32_12 : i32
    scf.if %16 {
      %c0_13 = arith.constant 0 : index
      %c0_14 = arith.constant 0 : index
      %17 = vector.load %arg6[%c0_13, %c0_14] : memref<8x1024xf32, #tpu.memory_space<vmem>>, vector<8x1024xf32>
      %cst_15 = arith.constant 6.250000e-02 : f32
      %18 = vector.broadcast %cst_15 : f32 to vector<8x1024xf32>
      %19 = arith.mulf %17, %18 : vector<8x1024xf32>
      %c0_16 = arith.constant 0 : index
      %c0_17 = arith.constant 0 : index
      %20 = vector.load %arg5[%c0_16, %c0_17] : memref<8x1024xf32, #tpu.memory_space<vmem>>, vector<8x1024xf32>
      tpu.vector_store %arg5[%c0_16, %c0_17], %19 {strides = array<i32>} : memref<8x1024xf32, #tpu.memory_space<vmem>>, vector<8x1024xf32>,
    } else {
    }
    return
  }
  func.func @transform_0(%arg0: i32, %arg1: i32, %arg2: i32) -> (i32, i32, i32) {
    %c0_i32 = arith.constant 0 : i32
    %c0_i32_0 = arith.constant 0 : i32
    return %arg0, %arg2, %c0_i32 : i32, i32, i32
  }
  func.func @transform_1(%arg0: i32, %arg1: i32, %arg2: i32) -> (i32, i32) {
    %c0_i32 = arith.constant 0 : i32
    %c0_i32_0 = arith.constant 0 : i32
    return %c0_i32, %arg1 : i32, i32
  }
  func.func @transform_2(%arg0: i32, %arg1: i32, %arg2: i32) -> (i32, i32) {
    %c0_i32 = arith.constant 0 : i32
    return %arg0, %arg1 : i32, i32
  }
}

</mosaic_0001>

<bundles_post_ra>
// kernel: tpu_custom_call.1
= control target key start
LH: loop header
LB: loop body
LE: loop exit
PB: predicated region body
PF: predicated region fallthrough
CT: control target
= control target key end

     0   :  { %7 = vsyncpa [#allocation4], 0  ;;  %s2847_s0 = inlined_call_operand.hbm [shape: bf16[8,16,49], index: 0, kind: input, shape index: {}]   ;;  %s2848_s1 = inlined_call_operand.hbm [shape: bf16[49,2048], index: 1, kind: input, shape index: {}]   ;;  %s2849_s2 = inlined_call_operand.hbm [shape: f32[8,2048], index: 2, kind: output, shape index: {}]  }
   0x1   :  { %8 = vsyncpa [#allocation7], 0 }
   0x2   :  { %10 = vsyncpa [#allocation7 + $0x1], 0 }
   0x3   :  { %11 = vsyncpa [#allocation5], 0 }
   0x4   :  { %13 = vsyncpa [#allocation5 + $0x1], 0  ;;  %s2192_s9 = smov 0   ;;  %s2194_s10 = smov 0  }
   0x5   :  { %s2196_s11 = smov 0   ;;  %s2198_s12 = smov 0  }
   0x6   :  { %s2200_s13 = smov 0   ;;  %s2202_s14 = smov 0  }
   0x7 LB: > { %s1836_s15 = sadd.s32 4294967295, %s2166_s14   ;;  %s1837_s16 = sadd.s32 4294967294, %s2166_s14   ;;  %s2166_s14 = sphi %s2202_s14, %s19_s14   ;;  %s2162_s13 = sphi %s2200_s13, %s2875_s13   ;;  %s2158_s12 = sphi %s2198_s12, %s2874_s12   ;;  %s2154_s11 = sphi %s2196_s11, %s2873_s11   ;;  %s2150_s10 = sphi %s2194_s10, %s2872_s10   ;;  %s2146_s9 = sphi %s2192_s9, %s2871_s9  }
   0x8   : > { %p80_p0 = scmp.ne.s32.totalorder %s2154_s11, %s2150_s10  ;;  %p81_p1 = scmp.eq.s32.totalorder %s2166_s14, 0 }
   0x9   : > { %p86_p2 = scmp.ne.s32.totalorder %s2150_s10, %s2146_s9  ;;  %p2229_p3 = scmp.eq.s32.totalorder %s1836_s15, 0 }
   0xa   : > { %p2233_p4 = por %p81_p1, %p80_p0  ;;  %p112_p5 = scmp.eq.s32.totalorder %s1836_s15, 1 }
   0xb   : > { %s2856_s17 = scalar_select %p2229_p3, 1, 0 }
   0xc   : > { %p2239_p6 = por %p2229_p3, %p86_p2  ;;  %p118_p7 = scmp.eq.s32.totalorder %s1837_s16, 1 }
   0xd   : > { %p2243_p8 = por %p112_p5, %p80_p0  ;;  %p1838_p9 = scmp.ge.s32.totalorder %s2166_s14, 1 }
   0xe   : > { %s2858_s19 = scalar_select %p2239_p6, 1, 0 }
   0xf   : > { %s2859_s20 = scalar_select %p2243_p8, 1, 0 }
  0x10   : > { %p2248_p10 = por %p118_p7, %p86_p2  ;;  %p125_p11 = scmp.lt.s32.totalorder %s2166_s14, 3 }
  0x11   : > { %s2168_s23 = smov [#allocation3]   ;;  %p1948_p1 = scmp.lt.s32.totalorder %s2166_s14, 2 }
  0x12   : > { %s2860_s21 = scalar_select %p2248_p10, 1, 0 }
  0x13   : > { %p2253_p12 = pnand %p1838_p9, %p125_p11  ;;  %s143_s24 = sshll.u32 %s2168_s23, 4  ;;  %s2257_s24 = int_to_ptr.vmem [resolvable:$true] %s143_s24 }
  0x14   : > { %p2271_p2 = pnand %p1948_p1, %p2233_p4  ;;  %s34_s27 = sadd.s32 1, %s2162_s13 }
  0x15   : > { %s2861_s22 = scalar_select %p2253_p12, 1, 0 }
  0x16   : > { %p1935_p13 = pneg %p2253_p12  ;;  %s2022_s30 = scalar_lea.hbm %s2847_s0, 1024 }
  0x17   : > { %s2863_s26 = scalar_select %p2271_p2, 1, 0 }
  0x18   : > { %p2265_p5 = pnand %p1935_p13, %p2229_p3  ;;  %p2023_p7 = scmp.ne.s32.totalorder %s2847_s0, %s2022_s30 }
  0x19   : > { %p2029_p4 = scmp.lt.u32.totalorder %s2022_s30, %s2847_s0 }
  0x1a   : > { %p2024_p9 = pneg %p2265_p5 }
  0x1c   : > { %p2025_p11 = pnand %p2024_p9, %p2023_p7 }
  0x1e   : > { %p2026_p13 = pneg %p2025_p11 }
  0x20   : > { %p2031_p1 = pnand %p2029_p4, %p2026_p13 }
  0x22   : > { %2034 = shalt.err (!%p2031_p1)
}
  0x23   : > { %s2035_s7 = scalar_lea.vmem %s2257_s24, 1024  ;;  %p2043_p6 = scmp.lt.s32.totalorder %s2257_s24, %s2257_s24 }
  0x24   : > { %p2036_p0 = scmp.ne.s32.totalorder %s2257_s24, %s2035_s7  ;;  %p2044_p3 = scmp.lt.s32.totalorder %s2035_s7, %s2035_s7 }
  0x26   : > { %p2038_p10 = pnand %p2036_p0, %p2024_p9  ;;  %p2045_p12 = por %p2044_p3, %p2043_p6 }
  0x28   : > { %p2039_p8 = pneg %p2038_p10 }
  0x2a   : > { %p2046_p2 = pnand %p2045_p12, %p2039_p8 }
  0x2c   : > { %2049 = shalt.err (!%p2046_p2)
}
  0x2d   : > { %s2169_s8 = smov 64   ;;  %s2170_s15 = smov 4  }
  0x2e   : > { %1938 = dma.hbm_to_vmem [thread:$0]  (!%p2265_p5), %s2847_s0, 1024, %s2257_s24, [#allocation4], %s2169_s8, %s2169_s8, %s2170_s15  }
  0x2f   : > { %p36_p10 = scmp.ge.s32.totalorder %s34_s27, 2  ;;  %s73_s23 = sadd.s32 1, %s2154_s11 }
  0x30   : > { %s157_s28 = sand.u32 1, %s2154_s11   ;;  %s1923_s3 = sshll.u32 %s2162_s13, 9 }
  0x31   : > { %s2877_s27 = smov (%p36_p10, %s34_s27), 0  ;;  %s1925_s29 = smul.u32 224, %s157_s28 }
  0x32   : > { %s70_s30 = ssub.s32 %s2162_s13, %s2877_s27  ;;  %s2307_s25 = scalar_lea.hbm %s2848_s1, %s1923_s3 }
  0x33   : > { %p71_p3 = scmp.eq.s32.totalorder %s70_s30, 0  ;;  %s161_s24 = scalar_lea.vmem [#allocation6], %s1925_s29 }
  0x34   : > { %s168_s6 = sshll.u32 %s161_s24, 4  ;;  %s2314_s8 = scalar_lea.sflag [#allocation7], %s157_s28  ;;  %s2312_s6 = int_to_ptr.vmem [resolvable:$true] %s168_s6 }
  0x35   : > { %s2310_s7 = scalar_select %p71_p3, %s2154_s11, %s73_s23  }
  0x36   : > { %s2050_s15 = scalar_lea.hbm %s2307_s25, 3584  ;;  %p2864_p8 = scmp.ne.s32.totalorder %s2863_s26, 0 }
  0x37   : > { %p2051_p6 = scmp.ne.s32.totalorder %s2307_s25, %s2050_s15  ;;  %s2055_s30 = scalar_lea.hbm %s2848_s1, 7168 }
  0x38   : > { %p2052_p12 = pneg %p2864_p8  ;;  %p2056_p2 = scmp.lt.u32.totalorder %s2307_s25, %s2848_s1 }
  0x39   : > { %p2057_p7 = scmp.lt.u32.totalorder %s2055_s30, %s2050_s15  ;;  %p2059_p11 = scmp.lt.u32.totalorder %s2050_s15, %s2307_s25 }
  0x3a   : > { %p2053_p0 = pnand %p2052_p12, %p2051_p6 }
  0x3b   : > { %p2058_p9 = por %p2057_p7, %p2056_p2 }
  0x3c   : > { %p2054_p5 = pneg %p2053_p0 }
  0x3d   : > { %p2060_p13 = por %p2059_p11, %p2058_p9 }
  0x3f   : > { %p2061_p4 = pnand %p2060_p13, %p2054_p5 }
  0x41   : > { %2064 = shalt.err (!%p2061_p4)
}
  0x42   : > { %s2065_s23 = scalar_lea.vmem %s2312_s6, 3584  ;;  %s2171_s28 = smov [#allocation6]  }
  0x43   : > { %p2066_p1 = scmp.ne.s32.totalorder %s2312_s6, %s2065_s23  ;;  %s2070_s4 = sshll.u32 %s2171_s28, 4  ;;  %s2071_s4 = int_to_ptr.vmem [resolvable:$false] %s2070_s4 }
  0x44   : > { %s2072_s5 = scalar_lea.vmem %s2071_s4, 7168  ;;  %p2073_p6 = scmp.lt.s32.totalorder %s2312_s6, %s2071_s4 }
  0x45   : > { %p2068_p10 = pnand %p2066_p1, %p2052_p12  ;;  %p2074_p0 = scmp.lt.s32.totalorder %s2072_s5, %s2065_s23 }
  0x47   : > { %p2069_p3 = pneg %p2068_p10  ;;  %p2075_p2 = por %p2074_p0, %p2073_p6 }
  0x49   : > { %p2076_p7 = pnand %p2075_p2, %p2069_p3 }
  0x4b   : > { %2079 = shalt.err (!%p2076_p7)
}
  0x4c   : > { %s2172_s24 = smov 1024   ;;  %s2173_s15 = smov 512  }
  0x4d   : > { %s2174_s16 = smov 32   ;;  %p2865_p12 = scmp.ne.s32.totalorder %s2861_s22, 0 }
  0x4e   : > { %1942 = dma.hbm_to_vmem [thread:$0]  (!%p2864_p8), %s2307_s25, 3584, %s2312_s6, %s2314_s8, %s2172_s24, %s2173_s15, %s2174_s16  }
  0x4f   : > { %180 = sbr.rel (%p2865_p12) target bundleno = 509 (0x1fd), region = 28  ;;  %p2866_p5 = scmp.ne.s32.totalorder (!%p2865_p12), %s2856_s17, 0 }
  0x56   : > { %2133 = dma.done.wait (%p2866_p5), [#allocation4], 1024  }
  0x57   : > { %2135 = vsyncadd (%p2866_p5), [#allocation4], 4294966272  ;;  %s2349_s18 = sand.u32 1, %s2150_s10   ;;  %p2867_p8 = scmp.ne.s32.totalorder %s2858_s19, 0 }
  0x58   : > { %s1926_s30 = smul.u32 224, %s2349_s18  ;;  %s187_s29 = scalar_lea.sflag [#allocation7], %s2349_s18 }
  0x5a   : > { %s2353_s3 = scalar_lea.vmem [#allocation6], %s1926_s30 }
  0x5b   : > { %2137 = dma.done.wait (%p2867_p8), %s187_s29, 3584  }
  0x5c   : > { %2139 = vsyncadd (%p2867_p8), %s187_s29, 4294963712  ;;  %v2175_v0 = vmov 0   ;;  %v244_v1 = vld [vmem:[%s2353_s3] sm:$0xff]  ;;  %v245_v3 = vld [vmem:[%s2353_s3 + $0x8] sm:$0xff]  ;;  %vm477_vm0 = vcmask 1040384   ;;  %vm452_vm1 = vcmask 400384  }
  0x5d   : > { %536 = vmatprep.mubr.bf16.mxu0 %v2175_v0  ;;  %649 = vmatprep.mubr.bf16.mxu1 %v2175_v0  ;;  %v248_v2 = vld [vmem:[%s2353_s3 + $0x20] sm:$0xff]  ;;  %v249_v5 = vld [vmem:[%s2353_s3 + $0x28] sm:$0xff]  ;;  %v2376_v26 = vsel %vm477_vm0, 65535, %v2175_v0  ;;  %v246_v33 = vld [vmem:[%s2353_s3 + $0x10] sm:$0xff]  ;;  %vm1604_vm2 = vcmask 1041409   ;;  %vm1606_vm3 = vcmask 1042434  }
  0x5e   : > { %v1855_v4 = vcombine.high %v244_v1, %v248_v2  ;;  %v1854_v6 = vcombine.low %v244_v1, %v248_v2  ;;  %v252_v7 = vld [vmem:[%s2353_s3 + $0x40] sm:$0xff]  ;;  %v1857_v9 = vcombine.high %v245_v3, %v249_v5  ;;  %v1856_v10 = vcombine.low %v245_v3, %v249_v5  ;;  %v253_v12 = vld [vmem:[%s2353_s3 + $0x48] sm:$0xff]  ;;  %v250_v34 = vld [vmem:[%s2353_s3 + $0x30] sm:$0xff]  ;;  %s1845_s17 = sshll.u32 %s2349_s18, 6  ;;  %s1924_s22 = sshll.u32 %s2158_s12, 10 }
  0x5f   : > { %v256_v8 = vld [vmem:[%s2353_s3 + $0x60] sm:$0xff]  ;;  %v257_v13 = vld [vmem:[%s2353_s3 + $0x68] sm:$0xff]  ;;  %v247_v36 = vld [vmem:[%s2353_s3 + $0x18] sm:$0xff]  ;;  %v1859_v41 = vcombine.high %v246_v33, %v250_v34  ;;  %v1858_v46 = vcombine.low %v246_v33, %v250_v34  ;;  %vm1608_vm4 = vcmask 1043459   ;;  %vm1610_vm5 = vcmask 1044484   ;;  %s2619_s19 = scalar_lea.vmem [#allocation8], %s1845_s17  ;;  %s2794_s8 = scalar_lea.hbm %s2849_s2, %s1924_s22 }
  0x60   : > { %v1863_v11 = vcombine.high %v252_v7, %v256_v8  ;;  %v260_v14 = vld [vmem:[%s2353_s3 + $0x80] sm:$0xff]  ;;  %504 = vmatprep.subr.bf16.mxu0 %v1855_v4  ;;  %v1865_v15 = vcombine.high %v253_v12, %v257_v13  ;;  %v261_v17 = vld [vmem:[%s2353_s3 + $0x88] sm:$0xff]  ;;  %617 = vmatprep.subr.bf16.mxu1 %v1857_v9  ;;  %v1862_v19 = vcombine.low %v252_v7, %v256_v8  ;;  %v251_v37 = vld [vmem:[%s2353_s3 + $0x38] sm:$0xff]  ;;  %vm1612_vm6 = vcmask 1045509   ;;  %s1735_s26 = sshll.u32 %s2619_s19, 4  ;;  %s1719_s12 = scalar_lea.sflag [#allocation5], %s2349_s18  ;;  %s2796_s26 = int_to_ptr.vmem [resolvable:$true] %s1735_s26 }
  0x61   : > { %v264_v16 = vld [vmem:[%s2353_s3 + $0xa0] sm:$0xff]  ;;  %v265_v18 = vld [vmem:[%s2353_s3 + $0xa8] sm:$0xff]  ;;  %505 = vmatpush1.bf16.msra.mxu0 %v1854_v6  ;;  %618 = vmatpush1.bf16.msra.mxu1 %v1856_v10  ;;  %v1864_v22 = vcombine.low %v253_v12, %v257_v13  ;;  %v1861_v42 = vcombine.high %v247_v36, %v251_v37  ;;  %v254_v43 = vld [vmem:[%s2353_s3 + $0x50] sm:$0xff]  ;;  %v1860_v48 = vcombine.low %v247_v36, %v251_v37  ;;  %vm1614_vm7 = vcmask 1046534   ;;  %s2080_s23 = scalar_lea.vmem %s2796_s26, 1024  ;;  %p2868_p11 = scmp.ne.s32.totalorder %s2859_s20, 0 }
  0x62   : > { %v268_v20 = vld [vmem:[%s2353_s3 + $0xc0] sm:$0x11]  ;;  %v269_v21 = vld [vmem:[%s2353_s3 + $0xc8] sm:$0x11]  ;;  %506 = vmatprep.subr.bf16.mxu0 %v1863_v11  ;;  %v1871_v23 = vcombine.high %v260_v14, %v264_v16  ;;  %619 = vmatprep.subr.bf16.mxu1 %v1865_v15  ;;  %v1873_v25 = vcombine.high %v261_v17, %v265_v18  ;;  %v1870_v28 = vcombine.low %v260_v14, %v264_v16  ;;  %v258_v44 = vld [vmem:[%s2353_s3 + $0x70] sm:$0xff]  ;;  %vm1616_vm8 = vcmask 1047559   ;;  %p2081_p9 = scmp.ne.s32.totalorder %s2796_s26, %s2080_s23 }
  0x63   : > { %v1879_v24 = vcombine.high %v268_v20, %v268_v20  ;;  %v1881_v27 = vcombine.high %v269_v21, %v269_v21  ;;  %v1878_v29 = vcombine.low %v268_v20, %v268_v20  ;;  %v1872_v30 = vcombine.low %v261_v17, %v265_v18  ;;  %v2386_v40 = vld [vmem:[#allocation3] sm:$0xff]   ;;  %v255_v45 = vld [vmem:[%s2353_s3 + $0x58] sm:$0xff]  ;;  %v262_v50 = vld [vmem:[%s2353_s3 + $0x90] sm:$0xff]  ;;  %s2176_s28 = smov [#allocation8]  }
  0x64   : > { %v1880_v32 = vcombine.low %v269_v21, %v269_v21  ;;  %v259_v47 = vld [vmem:[%s2353_s3 + $0x78] sm:$0xff]  ;;  %v1867_v49 = vcombine.high %v254_v43, %v258_v44  ;;  %v266_v51 = vld [vmem:[%s2353_s3 + $0xb0] sm:$0xff]  ;;  %v1866_v56 = vcombine.low %v254_v43, %v258_v44  ;;  %v2011_v62 = vld [vmem:[#allocation3 + $0x8] sm:$0xff]   ;;  %p2082_p13 = pnand %p2081_p9, %p2868_p11  ;;  %s2084_s4 = sshll.u32 %s2176_s28, 4  ;;  %s2085_s4 = int_to_ptr.vmem [resolvable:$false] %s2084_s4 }
  0x65   : > { %507 = vmatpush1.bf16.msra.mxu0 %v1862_v19  ;;  %620 = vmatpush1.bf16.msra.mxu1 %v1864_v22  ;;  %v484_v31 = vand.u32 %v1879_v24, %v2376_v26  ;;  %v490_v35 = vand.u32 %v1881_v27, %v2376_v26  ;;  %v481_v38 = vand.u32 %v1878_v29, %v2376_v26  ;;  %v263_v53 = vld [vmem:[%s2353_s3 + $0x98] sm:$0xff]  ;;  %v270_v55 = vld [vmem:[%s2353_s3 + $0xd0] sm:$0x11]  ;;  %v2014_v11 = vld [vmem:[#allocation3 + $0x20] sm:$0xff]   ;;  %s2086_s5 = scalar_lea.vmem %s2085_s4, 2048  ;;  %p2087_p1 = scmp.lt.s32.totalorder %s2796_s26, %s2085_s4 }
  0x66   : > { %508 = vmatprep.subr.bf16.mxu0 %v1871_v23  ;;  %621 = vmatprep.subr.bf16.mxu1 %v1873_v25  ;;  %v487_v39 = vand.u32 %v1880_v32, %v2376_v26  ;;  %v1869_v52 = vcombine.high %v255_v45, %v259_v47  ;;  %v267_v54 = vld [vmem:[%s2353_s3 + $0xb8] sm:$0xff]  ;;  %v1868_v58 = vcombine.low %v255_v45, %v259_v47  ;;  %v2012_v9 = vld [vmem:[#allocation3 + $0x10] sm:$0xff]   ;;  %v2015_v12 = vld [vmem:[#allocation3 + $0x28] sm:$0xff]   ;;  %p2083_p4 = pneg %p2082_p13  ;;  %p2088_p10 = scmp.lt.s32.totalorder %s2086_s5, %s2080_s23 }
  0x67   : > { %v271_v57 = vld [vmem:[%s2353_s3 + $0xd8] sm:$0x11]  ;;  %v1875_v59 = vcombine.high %v262_v50, %v266_v51  ;;  %v1877_v60 = vcombine.high %v263_v53, %v267_v54  ;;  %v1883_v61 = vcombine.high %v270_v55, %v270_v55  ;;  %v1874_v1 = vcombine.low %v262_v50, %v266_v51  ;;  %v2016_v13 = vld [vmem:[#allocation3 + $0x30] sm:$0xff]  }
  0x68   : > { %v1885_v63 = vcombine.high %v271_v57, %v271_v57  ;;  %v1882_v2 = vcombine.low %v270_v55, %v270_v55  ;;  %v1876_v3 = vcombine.low %v263_v53, %v267_v54  ;;  %v1884_v5 = vcombine.low %v271_v57, %v271_v57  ;;  %v2013_v10 = vld [vmem:[#allocation3 + $0x18] sm:$0xff]   ;;  %p2089_p3 = por %p2088_p10, %p2087_p1 }
  0x69   : > { %509 = vmatpush1.bf16.msra.mxu0 %v1870_v28  ;;  %622 = vmatpush1.bf16.msra.mxu1 %v1872_v30  ;;  %v496_v4 = vand.u32 %v1883_v61, %v2376_v26  ;;  %v2021_v14 = vld [vmem:[#allocation3 + $0x38] sm:$0xff]  }
  0x6a   : > { %510 = vmatprep.subr.bf16.mxu0 %v484_v31  ;;  %623 = vmatprep.subr.bf16.mxu1 %v490_v35  ;;  %v502_v6 = vand.u32 %v1885_v63, %v2376_v26  ;;  %v493_v7 = vand.u32 %v1882_v2, %v2376_v26  ;;  %v499_v8 = vand.u32 %v1884_v5, %v2376_v26  ;;  %p2090_p6 = pnand %p2089_p3, %p2083_p4 }
  0x6d   : > { %511 = vmatpush1.bf16.msra.mxu0 %v481_v38  ;;  %624 = vmatpush1.bf16.msra.mxu1 %v487_v39 }
  0x6e   : > { %730 = vmatprep.subr.bf16.mxu0 %v1859_v41  ;;  %843 = vmatprep.subr.bf16.mxu1 %v1861_v42 }
  0x70   : > { %1886 = vmatmul.mubr.msk.bf16.vlgmr.msra.gmra.mrb[0].mxu0 %vm452_vm1, %v2386_v40  ;;  %1894 = vmatmul.mubr.msk.bf16.vlgmr.msra.gmra.mrb[0].mxu1 %vm452_vm1, %v2386_v40 }
  0x71   : > { %731 = vmatpush1.bf16.msra.mxu0 %v1858_v46  ;;  %844 = vmatpush1.bf16.msra.mxu1 %v1860_v48 }
  0x72   : > { %546 = vmatprep.mubr.bf16.mxu0 %v2175_v0  ;;  %659 = vmatprep.mubr.bf16.mxu1 %v2175_v0 }
  0x73   : > { %732 = vmatprep.subr.bf16.mxu0 %v1867_v49  ;;  %845 = vmatprep.subr.bf16.mxu1 %v1869_v52 }
  0x75   : > { %733 = vmatpush1.bf16.msra.mxu0 %v1866_v56  ;;  %846 = vmatpush1.bf16.msra.mxu1 %v1868_v58 }
  0x76   : > { %734 = vmatprep.subr.bf16.mxu0 %v1875_v59  ;;  %847 = vmatprep.subr.bf16.mxu1 %v1877_v60 }
  0x78   : > { %1887 = vmatmul.mubr.msk.bf16.gmra.mrb[4].mxu0 %vm452_vm1, %v2011_v62  ;;  %1895 = vmatmul.mubr.msk.bf16.gmra.mrb[4].mxu1 %vm452_vm1, %v2011_v62 }
  0x79   : > { %556 = vmatprep.mubr.bf16.mxu0 %v2175_v0  ;;  %669 = vmatprep.mubr.bf16.mxu1 %v2175_v0 }
  0x7a   : > { %735 = vmatpush1.bf16.msra.mxu0 %v1874_v1  ;;  %848 = vmatpush1.bf16.msra.mxu1 %v1876_v3 }
  0x7b   : > { %736 = vmatprep.subr.bf16.mxu0 %v496_v4  ;;  %849 = vmatprep.subr.bf16.mxu1 %v502_v6 }
  0x7e   : > { %737 = vmatpush1.bf16.msra.mxu0 %v493_v7  ;;  %850 = vmatpush1.bf16.msra.mxu1 %v499_v8 }
  0x80   : > { %1888 = vmatmul.mubr.msk.bf16.gmra.mrb[8].mxu0 %vm452_vm1, %v2012_v9  ;;  %1896 = vmatmul.mubr.msk.bf16.gmra.mrb[8].mxu1 %vm452_vm1, %v2012_v9 }
  0x81   : > { %566 = vmatprep.mubr.bf16.mxu0 %v2175_v0  ;;  %679 = vmatprep.mubr.bf16.mxu1 %v2175_v0 }
  0x88   : > { %1889 = vmatmul.mubr.msk.bf16.gmra.mrb[12].mxu0 %vm452_vm1, %v2013_v10  ;;  %1897 = vmatmul.mubr.msk.bf16.gmra.mrb[12].mxu1 %vm452_vm1, %v2013_v10 }
  0x89   : > { %576 = vmatprep.mubr.bf16.mxu0 %v2175_v0  ;;  %689 = vmatprep.mubr.bf16.mxu1 %v2175_v0 }
  0x90   : > { %1890 = vmatmul.mubr.msk.bf16.gmra.mrb[16].mxu0 %vm452_vm1, %v2014_v11  ;;  %1898 = vmatmul.mubr.msk.bf16.gmra.mrb[16].mxu1 %vm452_vm1, %v2014_v11 }
  0x91   : > { %586 = vmatprep.mubr.bf16.mxu0 %v2175_v0  ;;  %699 = vmatprep.mubr.bf16.mxu1 %v2175_v0 }
  0x98   : > { %1891 = vmatmul.mubr.msk.bf16.gmra.mrb[20].mxu0 %vm452_vm1, %v2015_v12  ;;  %1899 = vmatmul.mubr.msk.bf16.gmra.mrb[20].mxu1 %vm452_vm1, %v2015_v12 }
  0x99   : > { %596 = vmatprep.mubr.bf16.mxu0 %v2175_v0  ;;  %709 = vmatprep.mubr.bf16.mxu1 %v2175_v0 }
  0xa0   : > { %1892 = vmatmul.mubr.msk.bf16.gmra.mrb[24].mxu0 %vm452_vm1, %v2016_v13  ;;  %1900 = vmatmul.mubr.msk.bf16.gmra.mrb[24].mxu1 %vm452_vm1, %v2016_v13 }
  0xa1   : > { %606 = vmatprep.mubr.bf16.mxu0 %v2175_v0  ;;  %719 = vmatprep.mubr.bf16.mxu1 %v2175_v0 }
  0xa8   : > { %1893 = vmatmul.mubr.msk.bf16.gmra.mrb[28].mxu0 %vm452_vm1, %v2021_v14  ;;  %1901 = vmatmul.mubr.msk.bf16.gmra.mrb[28].mxu1 %vm452_vm1, %v2021_v14 }
  0xa9   : > { %762 = vmatprep.mubr.bf16.mxu0 %v2175_v0  ;;  %875 = vmatprep.mubr.bf16.mxu1 %v2175_v0 }
  0xb0   : > { %1902 = vmatmul.mubr.msk.bf16.vlgmr.msra.gmra.mrb[32].mxu0 %vm452_vm1, %v2386_v40  ;;  %1910 = vmatmul.mubr.msk.bf16.vlgmr.msra.gmra.mrb[32].mxu1 %vm452_vm1, %v2386_v40 }
  0xb1   : > { %772 = vmatprep.mubr.bf16.mxu0 %v2175_v0  ;;  %885 = vmatprep.mubr.bf16.mxu1 %v2175_v0 }
  0xb8   : > { %1903 = vmatmul.mubr.msk.bf16.gmra.mrb[36].mxu0 %vm452_vm1, %v2011_v62  ;;  %1911 = vmatmul.mubr.msk.bf16.gmra.mrb[36].mxu1 %vm452_vm1, %v2011_v62 }
  0xb9   : > { %782 = vmatprep.mubr.bf16.mxu0 %v2175_v0  ;;  %895 = vmatprep.mubr.bf16.mxu1 %v2175_v0 }
  0xc0   : > { %1904 = vmatmul.mubr.msk.bf16.gmra.mrb[40].mxu0 %vm452_vm1, %v2012_v9  ;;  %1912 = vmatmul.mubr.msk.bf16.gmra.mrb[40].mxu1 %vm452_vm1, %v2012_v9 }
  0xc1   : > { %792 = vmatprep.mubr.bf16.mxu0 %v2175_v0  ;;  %905 = vmatprep.mubr.bf16.mxu1 %v2175_v0 }
  0xc8   : > { %1905 = vmatmul.mubr.msk.bf16.gmra.mrb[44].mxu0 %vm452_vm1, %v2013_v10  ;;  %1913 = vmatmul.mubr.msk.bf16.gmra.mrb[44].mxu1 %vm452_vm1, %v2013_v10 }
  0xc9   : > { %802 = vmatprep.mubr.bf16.mxu0 %v2175_v0  ;;  %915 = vmatprep.mubr.bf16.mxu1 %v2175_v0 }
  0xd0   : > { %1906 = vmatmul.mubr.msk.bf16.gmra.mrb[48].mxu0 %vm452_vm1, %v2014_v11  ;;  %1914 = vmatmul.mubr.msk.bf16.gmra.mrb[48].mxu1 %vm452_vm1, %v2014_v11 }
  0xd1   : > { %812 = vmatprep.mubr.bf16.mxu0 %v2175_v0  ;;  %925 = vmatprep.mubr.bf16.mxu1 %v2175_v0 }
  0xd8   : > { %1907 = vmatmul.mubr.msk.bf16.gmra.mrb[52].mxu0 %vm452_vm1, %v2015_v12  ;;  %1915 = vmatmul.mubr.msk.bf16.gmra.mrb[52].mxu1 %vm452_vm1, %v2015_v12 }
  0xd9   : > { %822 = vmatprep.mubr.bf16.mxu0 %v2175_v0  ;;  %935 = vmatprep.mubr.bf16.mxu1 %v2175_v0 }
  0xe0   : > { %1908 = vmatmul.mubr.msk.bf16.gmra.mrb[56].mxu0 %vm452_vm1, %v2016_v13  ;;  %1916 = vmatmul.mubr.msk.bf16.gmra.mrb[56].mxu1 %vm452_vm1, %v2016_v13 }
  0xe1   : > { %832 = vmatprep.mubr.bf16.mxu0 %v2175_v0  ;;  %945 = vmatprep.mubr.bf16.mxu1 %v2175_v0 }
  0xe8   : > { %1909 = vmatmul.mubr.msk.bf16.gmra.mrb[60].mxu0 %vm452_vm1, %v2021_v14  ;;  %1917 = vmatmul.mubr.msk.bf16.gmra.mrb[60].mxu1 %vm452_vm1, %v2021_v14 }
 0x143   : > { %v538_v15 = vpop.f32.mrb[0].mxu0  ;;  %v651_v16 = vpop.f32.mrb[0].mxu1 }
 0x144   : > { %v540_v17 = vpop.f32.mrb[1].mxu0  ;;  %v653_v18 = vpop.f32.mrb[1].mxu1  ;;  %v956_v20 = vmax.f32 %v538_v15, 0.0  ;;  %v958_v24 = vmax.f32 %v651_v16, 0.0 }
 0x145   : > { %v542_v19 = vpop.f32.mrb[2].mxu0  ;;  %v655_v22 = vpop.f32.mrb[2].mxu1  ;;  %v957_v25 = vmax.f32 %v540_v17, 0.0  ;;  %v959_v29 = vmax.f32 %v653_v18, 0.0 }
 0x146   : > { %v964_v21 = vmax.f32 %v542_v19, 0.0  ;;  %v544_v23 = vpop.f32.mrb[3].mxu0  ;;  %v966_v26 = vmax.f32 %v655_v22, 0.0  ;;  %v657_v28 = vpop.f32.mrb[3].mxu1 }
 0x147   : > { %v965_v27 = vmax.f32 %v544_v23, 0.0  ;;  %v967_v30 = vmax.f32 %v657_v28, 0.0 }
 0x148   : > { %v1092_v0 = vadd.f32 %v964_v21, %v956_v20  ;;  %v1106_v31 = vadd.f32 %v966_v26, %v958_v24 }
 0x149   : > { %v1099_v32 = vadd.f32 %v965_v27, %v957_v25  ;;  %v1113_v34 = vadd.f32 %v967_v30, %v959_v29 }
 0x14a   : > { %v1093_v33 = vrot.slane %v1092_v0, 4  ;;  %v1107_v35 = vrot.slane %v1106_v31, 4 }
 0x14b   : > { %v1100_v36 = vrot.slane %v1099_v32, 4  ;;  %v548_v37 = vpop.f32.mrb[4].mxu0  ;;  %v1114_v39 = vrot.slane %v1113_v34, 4  ;;  %v661_v41 = vpop.f32.mrb[4].mxu1 }
 0x14c   : > { %v1094_v38 = vadd.f32 %v1093_v33, %v1092_v0  ;;  %v972_v40 = vmax.f32 %v548_v37, 0.0  ;;  %v550_v42 = vpop.f32.mrb[5].mxu0  ;;  %v1108_v43 = vadd.f32 %v1107_v35, %v1106_v31  ;;  %v974_v45 = vmax.f32 %v661_v41, 0.0  ;;  %v663_v47 = vpop.f32.mrb[5].mxu1 }
 0x14d   : > { %v1101_v44 = vadd.f32 %v1100_v36, %v1099_v32  ;;  %v973_v46 = vmax.f32 %v550_v42, 0.0  ;;  %v552_v48 = vpop.f32.mrb[6].mxu0  ;;  %v1115_v50 = vadd.f32 %v1114_v39, %v1113_v34  ;;  %v975_v51 = vmax.f32 %v663_v47, 0.0  ;;  %v665_v53 = vpop.f32.mrb[6].mxu1 }
 0x14e   : > { %v1095_v49 = vrot.slane %v1094_v38, 2  ;;  %v980_v52 = vmax.f32 %v552_v48, 0.0  ;;  %v554_v54 = vpop.f32.mrb[7].mxu0  ;;  %v1109_v55 = vrot.slane %v1108_v43, 2  ;;  %v982_v57 = vmax.f32 %v665_v53, 0.0  ;;  %v667_v59 = vpop.f32.mrb[7].mxu1 }
 0x14f   : > { %v1102_v56 = vrot.slane %v1101_v44, 2  ;;  %v981_v58 = vmax.f32 %v554_v54, 0.0  ;;  %v1116_v61 = vrot.slane %v1115_v50, 2  ;;  %v983_v63 = vmax.f32 %v667_v59, 0.0 }
 0x150   : > { %v1096_v60 = vadd.f32 %v1095_v49, %v1094_v38  ;;  %v1148_v62 = vadd.f32 %v980_v52, %v972_v40  ;;  %v1110_v1 = vadd.f32 %v1109_v55, %v1108_v43  ;;  %v1162_v3 = vadd.f32 %v982_v57, %v974_v45 }
 0x151   : > { %v1103_v2 = vadd.f32 %v1102_v56, %v1101_v44  ;;  %v1155_v4 = vadd.f32 %v981_v58, %v973_v46  ;;  %v1117_v6 = vadd.f32 %v1116_v61, %v1115_v50  ;;  %v1169_v8 = vadd.f32 %v983_v63, %v975_v51 }
 0x152   : > { %v1097_v5 = vrot.slane %v1096_v60, 1  ;;  %v1149_v7 = vrot.slane %v1148_v62, 4  ;;  %v1111_v9 = vrot.slane %v1110_v1, 1  ;;  %v1163_v11 = vrot.slane %v1162_v3, 4 }
 0x153   : > { %v1104_v10 = vrot.slane %v1103_v2, 1  ;;  %v1156_v12 = vrot.slane %v1155_v4, 4  ;;  %v558_v13 = vpop.f32.mrb[8].mxu0  ;;  %v1118_v15 = vrot.slane %v1117_v6, 1  ;;  %v1170_v17 = vrot.slane %v1169_v8, 4  ;;  %v671_v18 = vpop.f32.mrb[8].mxu1 }
 0x154   : > { %v1098_v14 = vadd.f32 %v1097_v5, %v1096_v60  ;;  %v1150_v16 = vadd.f32 %v1149_v7, %v1148_v62  ;;  %v560_v19 = vpop.f32.mrb[9].mxu0  ;;  %v1112_v20 = vadd.f32 %v1111_v9, %v1110_v1  ;;  %v1164_v22 = vadd.f32 %v1163_v11, %v1162_v3  ;;  %v673_v24 = vpop.f32.mrb[9].mxu1 }
 0x155   : > { %v1105_v21 = vadd.f32 %v1104_v10, %v1103_v2  ;;  %v1157_v23 = vadd.f32 %v1156_v12, %v1155_v4  ;;  %v562_v25 = vpop.f32.mrb[10].mxu0  ;;  %v1119_v26 = vadd.f32 %v1118_v15, %v1117_v6  ;;  %v1171_v28 = vadd.f32 %v1170_v17, %v1169_v8  ;;  %v675_v0 = vpop.f32.mrb[10].mxu1 }
 0x156   : > { %v1151_v27 = vrot.slane %v1150_v16, 2  ;;  %v988_v29 = vmax.f32 %v558_v13, 0.0  ;;  %v564_v30 = vpop.f32.mrb[11].mxu0  ;;  %v1165_v31 = vrot.slane %v1164_v22, 2  ;;  %v990_v33 = vmax.f32 %v671_v18, 0.0  ;;  %v677_v35 = vpop.f32.mrb[11].mxu1 }
 0x157   : > { %v1158_v32 = vrot.slane %v1157_v23, 2  ;;  %v989_v34 = vmax.f32 %v560_v19, 0.0  ;;  %v1172_v37 = vrot.slane %v1171_v28, 2  ;;  %v991_v38 = vmax.f32 %v673_v24, 0.0 }
 0x158   : > { %v1152_v36 = vadd.f32 %v1151_v27, %v1150_v16  ;;  %v996_v39 = vmax.f32 %v562_v25, 0.0  ;;  %v1166_v40 = vadd.f32 %v1165_v31, %v1164_v22  ;;  %v998_v42 = vmax.f32 %v675_v0, 0.0 }
 0x159   : > { %v1159_v41 = vadd.f32 %v1158_v32, %v1157_v23  ;;  %v997_v43 = vmax.f32 %v564_v30, 0.0  ;;  %v1173_v45 = vadd.f32 %v1172_v37, %v1171_v28  ;;  %v999_v47 = vmax.f32 %v677_v35, 0.0 }
 0x15a   : > { %v1153_v44 = vrot.slane %v1152_v36, 1  ;;  %v1204_v46 = vadd.f32 %v996_v39, %v988_v29  ;;  %v1167_v48 = vrot.slane %v1166_v40, 1  ;;  %v1218_v50 = vadd.f32 %v998_v42, %v990_v33 }
 0x15b   : > { %v1160_v49 = vrot.slane %v1159_v41, 1  ;;  %v1211_v51 = vadd.f32 %v997_v43, %v989_v34  ;;  %v568_v52 = vpop.f32.mrb[12].mxu0  ;;  %v1174_v54 = vrot.slane %v1173_v45, 1  ;;  %v1225_v56 = vadd.f32 %v999_v47, %v991_v38  ;;  %v681_v57 = vpop.f32.mrb[12].mxu1 }
 0x15c   : > { %v1154_v53 = vadd.f32 %v1153_v44, %v1152_v36  ;;  %v1205_v55 = vrot.slane %v1204_v46, 4  ;;  %v570_v58 = vpop.f32.mrb[13].mxu0  ;;  %v1168_v59 = vadd.f32 %v1167_v48, %v1166_v40  ;;  %v1219_v61 = vrot.slane %v1218_v50, 4  ;;  %v683_v63 = vpop.f32.mrb[13].mxu1 }
 0x15d   : > { %v1161_v60 = vadd.f32 %v1160_v49, %v1159_v41  ;;  %v1212_v62 = vrot.slane %v1211_v51, 4  ;;  %v572_v1 = vpop.f32.mrb[14].mxu0  ;;  %v1175_v3 = vadd.f32 %v1174_v54, %v1173_v45  ;;  %v1226_v5 = vrot.slane %v1225_v56, 4  ;;  %v685_v6 = vpop.f32.mrb[14].mxu1 }
 0x15e   : > { %v1605_v2 = vsel %vm1604_vm2, %v1154_v53, %v1098_v14  ;;  %v1206_v4 = vadd.f32 %v1205_v55, %v1204_v46  ;;  %v574_v7 = vpop.f32.mrb[15].mxu0  ;;  %v1625_v8 = vsel %vm1604_vm2, %v1168_v59, %v1112_v20  ;;  %v1220_v10 = vadd.f32 %v1219_v61, %v1218_v50  ;;  %v687_v12 = vpop.f32.mrb[15].mxu1 }
 0x15f   : > { %v1618_v9 = vsel %vm1604_vm2, %v1161_v60, %v1105_v21  ;;  %v1213_v11 = vadd.f32 %v1212_v62, %v1211_v51  ;;  %v1632_v13 = vsel %vm1604_vm2, %v1175_v3, %v1119_v26  ;;  %v1227_v16 = vadd.f32 %v1226_v5, %v1225_v56 }
 0x160   : > { %v1207_v15 = vrot.slane %v1206_v4, 2  ;;  %v1004_v17 = vmax.f32 %v568_v52, 0.0  ;;  %v1221_v18 = vrot.slane %v1220_v10, 2  ;;  %v1006_v14 = vmax.f32 %v681_v57, 0.0 }
 0x161   : > { %v1214_v19 = vrot.slane %v1213_v11, 2  ;;  %v1005_v22 = vmax.f32 %v570_v58, 0.0  ;;  %v1228_v24 = vrot.slane %v1227_v16, 2  ;;  %v1007_v25 = vmax.f32 %v683_v63, 0.0 }
 0x162   : > { %v1208_v23 = vadd.f32 %v1207_v15, %v1206_v4  ;;  %v1012_v27 = vmax.f32 %v572_v1, 0.0  ;;  %v1222_v28 = vadd.f32 %v1221_v18, %v1220_v10  ;;  %v1014_v29 = vmax.f32 %v685_v6, 0.0 }
 0x163   : > { %v1215_v20 = vadd.f32 %v1214_v19, %v1213_v11  ;;  %v1013_v21 = vmax.f32 %v574_v7, 0.0  ;;  %v578_v0 = vpop.f32.mrb[16].mxu0  ;;  %v1229_v31 = vadd.f32 %v1228_v24, %v1227_v16  ;;  %v1015_v26 = vmax.f32 %v687_v12, 0.0  ;;  %v691_v33 = vpop.f32.mrb[16].mxu1 }
 0x164   : > { %v1209_v30 = vrot.slane %v1208_v23, 1  ;;  %v1260_v32 = vadd.f32 %v1012_v27, %v1004_v17  ;;  %v580_v34 = vpop.f32.mrb[17].mxu0  ;;  %v1223_v35 = vrot.slane %v1222_v28, 1  ;;  %v1274_v37 = vadd.f32 %v1014_v29, %v1006_v14  ;;  %v693_v39 = vpop.f32.mrb[17].mxu1 }
 0x165   : > { %v1216_v36 = vrot.slane %v1215_v20, 1  ;;  %v1267_v38 = vadd.f32 %v1013_v21, %v1005_v22  ;;  %v582_v40 = vpop.f32.mrb[18].mxu0  ;;  %v1230_v42 = vrot.slane %v1229_v31, 1  ;;  %v1281_v44 = vadd.f32 %v1015_v26, %v1007_v25  ;;  %v695_v45 = vpop.f32.mrb[18].mxu1 }
 0x166   : > { %v1210_v41 = vadd.f32 %v1209_v30, %v1208_v23  ;;  %v1261_v43 = vrot.slane %v1260_v32, 4  ;;  %v584_v46 = vpop.f32.mrb[19].mxu0  ;;  %v1224_v47 = vadd.f32 %v1223_v35, %v1222_v28  ;;  %v1275_v49 = vrot.slane %v1274_v37, 4  ;;  %v697_v51 = vpop.f32.mrb[19].mxu1 }
 0x167   : > { %v1217_v48 = vadd.f32 %v1216_v36, %v1215_v20  ;;  %v1268_v50 = vrot.slane %v1267_v38, 4  ;;  %v1231_v53 = vadd.f32 %v1230_v42, %v1229_v31  ;;  %v1282_v55 = vrot.slane %v1281_v44, 4 }
 0x168   : > { %v1607_v52 = vsel %vm1606_vm3, %v1210_v41, %v1605_v2  ;;  %v1262_v54 = vadd.f32 %v1261_v43, %v1260_v32  ;;  %v1626_v56 = vsel %vm1606_vm3, %v1224_v47, %v1625_v8  ;;  %v1276_v58 = vadd.f32 %v1275_v49, %v1274_v37 }
 0x169   : > { %v1619_v57 = vsel %vm1606_vm3, %v1217_v48, %v1618_v9  ;;  %v1269_v59 = vadd.f32 %v1268_v50, %v1267_v38  ;;  %v1633_v60 = vsel %vm1606_vm3, %v1231_v53, %v1632_v13  ;;  %v1283_v62 = vadd.f32 %v1282_v55, %v1281_v44 }
 0x16a   : > { %v1263_v61 = vrot.slane %v1262_v54, 2  ;;  %v1020_v63 = vmax.f32 %v578_v0, 0.0  ;;  %v1277_v1 = vrot.slane %v1276_v58, 2  ;;  %v1022_v4 = vmax.f32 %v691_v33, 0.0 }
 0x16b   : > { %v1270_v3 = vrot.slane %v1269_v59, 2  ;;  %v1021_v5 = vmax.f32 %v580_v34, 0.0  ;;  %v2476_v6 = vpop.f32.mrb[20].mxu0  ;;  %v1284_v7 = vrot.slane %v1283_v62, 2  ;;  %v1023_v10 = vmax.f32 %v693_v39, 0.0  ;;  %v2478_v8 = vpop.f32.mrb[20].mxu1 }
 0x16c   : > { %v1264_v2 = vadd.f32 %v1263_v61, %v1262_v54  ;;  %v1028_v11 = vmax.f32 %v582_v40, 0.0  ;;  %v2480_v9 = vpop.f32.mrb[21].mxu0  ;;  %v1278_v12 = vadd.f32 %v1277_v1, %v1276_v58  ;;  %v1030_v13 = vmax.f32 %v695_v45, 0.0  ;;  %v2482_v17 = vpop.f32.mrb[21].mxu1 }
 0x16d   : > { %v1271_v15 = vadd.f32 %v1270_v3, %v1269_v59  ;;  %v1029_v16 = vmax.f32 %v584_v46, 0.0  ;;  %v592_v18 = vpop.f32.mrb[22].mxu0  ;;  %v1285_v14 = vadd.f32 %v1284_v7, %v1283_v62  ;;  %v1031_v23 = vmax.f32 %v697_v51, 0.0  ;;  %v705_v24 = vpop.f32.mrb[22].mxu1 }
 0x16e   : > { %v1265_v19 = vrot.slane %v1264_v2, 1  ;;  %v1316_v22 = vadd.f32 %v1028_v11, %v1020_v63  ;;  %v594_v25 = vpop.f32.mrb[23].mxu0  ;;  %v1279_v27 = vrot.slane %v1278_v12, 1  ;;  %v1330_v20 = vadd.f32 %v1030_v13, %v1022_v4  ;;  %v707_v21 = vpop.f32.mrb[23].mxu1 }
 0x16f   : > { %v1272_v28 = vrot.slane %v1271_v15, 1  ;;  %v1323_v29 = vadd.f32 %v1029_v16, %v1021_v5  ;;  %v1286_v30 = vrot.slane %v1285_v14, 1  ;;  %v1337_v32 = vadd.f32 %v1031_v23, %v1023_v10 }
 0x170   : > { %v1266_v0 = vadd.f32 %v1265_v19, %v1264_v2  ;;  %v1317_v31 = vrot.slane %v1316_v22, 4  ;;  %v1280_v26 = vadd.f32 %v1279_v27, %v1278_v12  ;;  %v1331_v34 = vrot.slane %v1330_v20, 4 }
 0x171   : > { %v1273_v33 = vadd.f32 %v1272_v28, %v1271_v15  ;;  %v1324_v35 = vrot.slane %v1323_v29, 4  ;;  %v1287_v37 = vadd.f32 %v1286_v30, %v1285_v14  ;;  %v1338_v39 = vrot.slane %v1337_v32, 4 }
 0x172   : > { %v1609_v36 = vsel %vm1608_vm4, %v1266_v0, %v1607_v52  ;;  %v1318_v38 = vadd.f32 %v1317_v31, %v1316_v22  ;;  %v1627_v40 = vsel %vm1608_vm4, %v1280_v26, %v1626_v56  ;;  %v1332_v42 = vadd.f32 %v1331_v34, %v1330_v20 }
 0x173   : > { %v1620_v41 = vsel %vm1608_vm4, %v1273_v33, %v1619_v57  ;;  %v1325_v43 = vadd.f32 %v1324_v35, %v1323_v29  ;;  %v2487_v44 = vpop.f32.mrb[24].mxu0  ;;  %v1634_v45 = vsel %vm1608_vm4, %v1287_v37, %v1633_v60  ;;  %v1339_v47 = vadd.f32 %v1338_v39, %v1337_v32  ;;  %v2491_v49 = vpop.f32.mrb[24].mxu1 }
 0x174   : > { %v1319_v46 = vrot.slane %v1318_v38, 2  ;;  %v1036_v48 = vmax.f32 %v2476_v6, 0.0  ;;  %v2493_v50 = vpop.f32.mrb[25].mxu0  ;;  %v1333_v51 = vrot.slane %v1332_v42, 2  ;;  %v1038_v53 = vmax.f32 %v2478_v8, 0.0  ;;  %v2497_v55 = vpop.f32.mrb[25].mxu1 }
 0x175   : > { %v1326_v52 = vrot.slane %v1325_v43, 2  ;;  %v1037_v54 = vmax.f32 %v2480_v9, 0.0  ;;  %v2499_v56 = vpop.f32.mrb[26].mxu0  ;;  %v1340_v58 = vrot.slane %v1339_v47, 2  ;;  %v1039_v59 = vmax.f32 %v2482_v17, 0.0  ;;  %v2502_v61 = vpop.f32.mrb[26].mxu1 }
 0x176   : > { %v1320_v57 = vadd.f32 %v1319_v46, %v1318_v38  ;;  %v1044_v60 = vmax.f32 %v592_v18, 0.0  ;;  %v2504_v62 = vpop.f32.mrb[27].mxu0  ;;  %v1334_v63 = vadd.f32 %v1333_v51, %v1332_v42  ;;  %v1046_v3 = vmax.f32 %v705_v24, 0.0  ;;  %v2506_v5 = vpop.f32.mrb[27].mxu1 }
 0x177   : > { %v1327_v1 = vadd.f32 %v1326_v52, %v1325_v43  ;;  %v1045_v4 = vmax.f32 %v594_v25, 0.0  ;;  %v1341_v2 = vadd.f32 %v1340_v58, %v1339_v47  ;;  %v1047_v10 = vmax.f32 %v707_v21, 0.0 }
 0x178   : > { %v1321_v6 = vrot.slane %v1320_v57, 1  ;;  %v1372_v7 = vadd.f32 %v1044_v60, %v1036_v48  ;;  %v1335_v11 = vrot.slane %v1334_v63, 1  ;;  %v1386_v9 = vadd.f32 %v1046_v3, %v1038_v53 }
 0x179   : > { %v1328_v8 = vrot.slane %v1327_v1, 1  ;;  %v1379_v12 = vadd.f32 %v1045_v4, %v1037_v54  ;;  %v1342_v13 = vrot.slane %v1341_v2, 1  ;;  %v1393_v17 = vadd.f32 %v1047_v10, %v1039_v59 }
 0x17a   : > { %v1322_v15 = vadd.f32 %v1321_v6, %v1320_v57  ;;  %v1373_v16 = vrot.slane %v1372_v7, 4  ;;  %v1336_v18 = vadd.f32 %v1335_v11, %v1334_v63  ;;  %v1387_v14 = vrot.slane %v1386_v9, 4 }
 0x17b   : > { %v1329_v19 = vadd.f32 %v1328_v8, %v1327_v1  ;;  %v1380_v22 = vrot.slane %v1379_v12, 4  ;;  %v2508_v23 = vpop.f32.mrb[28].mxu0  ;;  %v1343_v25 = vadd.f32 %v1342_v13, %v1341_v2  ;;  %v1394_v28 = vrot.slane %v1393_v17, 4  ;;  %v2511_v20 = vpop.f32.mrb[28].mxu1 }
 0x17c   : > { %v1611_v24 = vsel %vm1610_vm5, %v1322_v15, %v1609_v36  ;;  %v1374_v27 = vadd.f32 %v1373_v16, %v1372_v7  ;;  %v2513_v29 = vpop.f32.mrb[29].mxu0  ;;  %v1628_v21 = vsel %vm1610_vm5, %v1336_v18, %v1627_v40  ;;  %v1388_v30 = vadd.f32 %v1387_v14, %v1386_v9  ;;  %v2517_v32 = vpop.f32.mrb[29].mxu1 }
 0x17d   : > { %v1621_v0 = vsel %vm1610_vm5, %v1329_v19, %v1620_v41  ;;  %v1381_v31 = vadd.f32 %v1380_v22, %v1379_v12  ;;  %v2519_v26 = vpop.f32.mrb[30].mxu0  ;;  %v1635_v33 = vsel %vm1610_vm5, %v1343_v25, %v1634_v45  ;;  %v1395_v35 = vadd.f32 %v1394_v28, %v1393_v17  ;;  %v2523_v37 = vpop.f32.mrb[30].mxu1 }
 0x17e   : > { %v1375_v34 = vrot.slane %v1374_v27, 2  ;;  %v1052_v36 = vmax.f32 %v2487_v44, 0.0  ;;  %v2525_v38 = vpop.f32.mrb[31].mxu0  ;;  %v1389_v39 = vrot.slane %v1388_v30, 2  ;;  %v1054_v41 = vmax.f32 %v2491_v49, 0.0  ;;  %v2529_v43 = vpop.f32.mrb[31].mxu1 }
 0x17f   : > { %v1382_v40 = vrot.slane %v1381_v31, 2  ;;  %v1053_v42 = vmax.f32 %v2493_v50, 0.0  ;;  %v1396_v47 = vrot.slane %v1395_v35, 2  ;;  %v1055_v45 = vmax.f32 %v2497_v55, 0.0 }
 0x180   : > { %v1376_v46 = vadd.f32 %v1375_v34, %v1374_v27  ;;  %v1060_v48 = vmax.f32 %v2499_v56, 0.0  ;;  %v1390_v51 = vadd.f32 %v1389_v39, %v1388_v30  ;;  %v1062_v52 = vmax.f32 %v2502_v61, 0.0 }
 0x181   : > { %v1383_v44 = vadd.f32 %v1382_v40, %v1381_v31  ;;  %v1061_v53 = vmax.f32 %v2504_v62, 0.0  ;;  %v1397_v57 = vadd.f32 %v1396_v47, %v1395_v35  ;;  %v1063_v49 = vmax.f32 %v2506_v5, 0.0 }
 0x182   : > { %v1377_v54 = vrot.slane %v1376_v46, 1  ;;  %v1428_v58 = vadd.f32 %v1060_v48, %v1052_v36  ;;  %v1391_v50 = vrot.slane %v1390_v51, 1  ;;  %v1442_v60 = vadd.f32 %v1062_v52, %v1054_v41 }
 0x183   : > { %v1384_v59 = vrot.slane %v1383_v44, 1  ;;  %v1435_v63 = vadd.f32 %v1061_v53, %v1053_v42  ;;  %v2536_v1 = vpop.f32.mrb[32].mxu0  ;;  %v1398_v3 = vrot.slane %v1397_v57, 1  ;;  %v1449_v4 = vadd.f32 %v1063_v49, %v1055_v45  ;;  %v2538_v6 = vpop.f32.mrb[32].mxu1 }
 0x184   : > { %v1378_v55 = vadd.f32 %v1377_v54, %v1376_v46  ;;  %v1429_v56 = vrot.slane %v1428_v58, 4  ;;  %v2540_v61 = vpop.f32.mrb[33].mxu0  ;;  %v1392_v62 = vadd.f32 %v1391_v50, %v1390_v51  ;;  %v1443_v7 = vrot.slane %v1442_v60, 4  ;;  %v2542_v5 = vpop.f32.mrb[33].mxu1 }
 0x185   : > { %v1385_v2 = vadd.f32 %v1384_v59, %v1383_v44  ;;  %v1436_v10 = vrot.slane %v1435_v63, 4  ;;  %v2544_v11 = vpop.f32.mrb[34].mxu0  ;;  %v1399_v9 = vadd.f32 %v1398_v3, %v1397_v57  ;;  %v1450_v15 = vrot.slane %v1449_v4, 4  ;;  %v2547_v13 = vpop.f32.mrb[34].mxu1 }
 0x186   : > { %v1613_v8 = vsel %vm1612_vm6, %v1378_v55, %v1611_v24  ;;  %v1430_v12 = vadd.f32 %v1429_v56, %v1428_v58  ;;  %v2549_v16 = vpop.f32.mrb[35].mxu0  ;;  %v1629_v17 = vsel %vm1612_vm6, %v1392_v62, %v1628_v21  ;;  %v1444_v19 = vadd.f32 %v1443_v7, %v1442_v60  ;;  %v2553_v22 = vpop.f32.mrb[35].mxu1 }
 0x187   : > { %v1622_v18 = vsel %vm1612_vm6, %v1385_v2, %v1621_v0  ;;  %v1437_v14 = vadd.f32 %v1436_v10, %v1435_v63  ;;  %v1636_v25 = vsel %vm1612_vm6, %v1399_v9, %v1635_v33  ;;  %v1451_v28 = vadd.f32 %v1450_v15, %v1449_v4 }
 0x188   : > { %v1431_v27 = vrot.slane %v1430_v12, 2  ;;  %v1068_v24 = vmax.f32 %v2508_v23, 0.0  ;;  %v1445_v30 = vrot.slane %v1444_v19, 2  ;;  %v1070_v34 = vmax.f32 %v2511_v20, 0.0 }
 0x189   : > { %v1438_v31 = vrot.slane %v1437_v14, 2  ;;  %v1069_v35 = vmax.f32 %v2513_v29, 0.0  ;;  %v1452_v21 = vrot.slane %v1451_v28, 2  ;;  %v1071_v0 = vmax.f32 %v2517_v32, 0.0 }
 0x18a   : > { %v1432_v36 = vadd.f32 %v1431_v27, %v1430_v12  ;;  %v1076_v39 = vmax.f32 %v2519_v26, 0.0  ;;  %v1446_v40 = vadd.f32 %v1445_v30, %v1444_v19  ;;  %v1078_v33 = vmax.f32 %v2523_v37, 0.0 }
 0x18b   : > { %v1439_v41 = vadd.f32 %v1438_v31, %v1437_v14  ;;  %v1077_v42 = vmax.f32 %v2525_v38, 0.0  ;;  %v2563_v46 = vpop.f32.mrb[36].mxu0  ;;  %v1453_v47 = vadd.f32 %v1452_v21, %v1451_v28  ;;  %v1079_v20 = vmax.f32 %v2529_v43, 0.0  ;;  %v2566_v29 = vpop.f32.mrb[36].mxu1 }
 0x18c   : > { %v1433_v23 = vrot.slane %v1432_v36, 1  ;;  %v1484_v45 = vadd.f32 %v1076_v39, %v1068_v24  ;;  %v2568_v48 = vpop.f32.mrb[37].mxu0  ;;  %v1447_v32 = vrot.slane %v1446_v40, 1  ;;  %v1498_v26 = vadd.f32 %v1078_v33, %v1070_v34  ;;  %v2570_v52 = vpop.f32.mrb[37].mxu1 }
 0x18d   : > { %v1440_v51 = vrot.slane %v1439_v41, 1  ;;  %v1491_v44 = vadd.f32 %v1077_v42, %v1069_v35  ;;  %v2572_v37 = vpop.f32.mrb[38].mxu0  ;;  %v1454_v53 = vrot.slane %v1453_v47, 1  ;;  %v1505_v57 = vadd.f32 %v1079_v20, %v1071_v0  ;;  %v2574_v58 = vpop.f32.mrb[38].mxu1 }
 0x18e   : > { %v1434_v38 = vadd.f32 %v1433_v23, %v1432_v36  ;;  %v1485_v54 = vrot.slane %v1484_v45, 4  ;;  %v2576_v49 = vpop.f32.mrb[39].mxu0  ;;  %v1448_v43 = vadd.f32 %v1447_v32, %v1446_v40  ;;  %v1499_v59 = vrot.slane %v1498_v26, 4  ;;  %v2578_v63 = vpop.f32.mrb[39].mxu1 }
 0x18f   : > { %v1441_v50 = vadd.f32 %v1440_v51, %v1439_v41  ;;  %v1492_v60 = vrot.slane %v1491_v44, 4  ;;  %v1455_v3 = vadd.f32 %v1454_v53, %v1453_v47  ;;  %v1506_v4 = vrot.slane %v1505_v57, 4 }
 0x190   : > { %v1615_v55 = vsel %vm1614_vm7, %v1434_v38, %v1613_v8  ;;  %v1486_v56 = vadd.f32 %v1485_v54, %v1484_v45  ;;  %v1630_v62 = vsel %vm1614_vm7, %v1448_v43, %v1629_v17  ;;  %v1500_v7 = vadd.f32 %v1499_v59, %v1498_v26 }
 0x191   : > { %v1623_v2 = vsel %vm1614_vm7, %v1441_v50, %v1622_v18  ;;  %v1493_v10 = vadd.f32 %v1492_v60, %v1491_v44  ;;  %v1637_v9 = vsel %vm1614_vm7, %v1455_v3, %v1636_v25  ;;  %v1507_v15 = vadd.f32 %v1506_v4, %v1505_v57 }
 0x192   : > { %v1487_v12 = vrot.slane %v1486_v56, 2  ;;  %v960_v19 = vmax.f32 %v2536_v1, 0.0  ;;  %v1501_v14 = vrot.slane %v1500_v7, 2  ;;  %v962_v28 = vmax.f32 %v2538_v6, 0.0 }
 0x193   : > { %v1494_v27 = vrot.slane %v1493_v10, 2  ;;  %v961_v8 = vmax.f32 %v2540_v61, 0.0  ;;  %v2587_v24 = vpop.f32.mrb[40].mxu0  ;;  %v1508_v17 = vrot.slane %v1507_v15, 2  ;;  %v963_v18 = vmax.f32 %v2542_v5, 0.0  ;;  %v2591_v25 = vpop.f32.mrb[40].mxu1 }
 0x194   : > { %v1488_v30 = vadd.f32 %v1487_v12, %v1486_v56  ;;  %v968_v31 = vmax.f32 %v2544_v11, 0.0  ;;  %v2593_v34 = vpop.f32.mrb[41].mxu0  ;;  %v1502_v1 = vadd.f32 %v1501_v14, %v1500_v7  ;;  %v970_v36 = vmax.f32 %v2547_v13, 0.0  ;;  %v2597_v61 = vpop.f32.mrb[41].mxu1 }
 0x195   : > { %v1495_v35 = vadd.f32 %v1494_v27, %v1493_v10  ;;  %v969_v6 = vmax.f32 %v2549_v16, 0.0  ;;  %v2599_v21 = vpop.f32.mrb[42].mxu0  ;;  %v1509_v39 = vadd.f32 %v1508_v17, %v1507_v15  ;;  %v971_v40 = vmax.f32 %v2553_v22, 0.0  ;;  %v2602_v11 = vpop.f32.mrb[42].mxu1 }
 0x196   : > { %v1489_v0 = vrot.slane %v1488_v30, 1  ;;  %v1120_v5 = vadd.f32 %v968_v31, %v960_v19  ;;  %v2604_v41 = vpop.f32.mrb[43].mxu0  ;;  %v1503_v33 = vrot.slane %v1502_v1, 1  ;;  %v1134_v23 = vadd.f32 %v970_v36, %v962_v28  ;;  %v2607_v47 = vpop.f32.mrb[43].mxu1 }
 0x197   : > { %v1496_v42 = vrot.slane %v1495_v35, 1  ;;  %v1127_v13 = vadd.f32 %v969_v6, %v961_v8  ;;  %v1510_v45 = vrot.slane %v1509_v39, 1  ;;  %v1141_v32 = vadd.f32 %v971_v40, %v963_v18 }
 0x198   : > { %v1490_v16 = vadd.f32 %v1489_v0, %v1488_v30  ;;  %v1121_v20 = vrot.slane %v1120_v5, 4  ;;  %v1504_v51 = vadd.f32 %v1503_v33, %v1502_v1  ;;  %v1135_v44 = vrot.slane %v1134_v23, 4 }
 0x199   : > { %v1497_v26 = vadd.f32 %v1496_v42, %v1495_v35  ;;  %v1128_v38 = vrot.slane %v1127_v13, 4  ;;  %v1511_v53 = vadd.f32 %v1510_v45, %v1509_v39  ;;  %v1142_v57 = vrot.slane %v1141_v32, 4 }
 0x19a   : > { %v1617_v22 = vsel %vm1616_vm8, %v1490_v16, %v1615_v55  ;;  %v1122_v54 = vadd.f32 %v1121_v20, %v1120_v5  ;;  %v1631_v50 = vsel %vm1616_vm8, %v1504_v51, %v1630_v62  ;;  %v1136_v60 = vadd.f32 %v1135_v44, %v1134_v23 }
 0x19b   : > { %v1702_v43 = vmul.f32 0.0625, %v1617_v22  ;;  %v1624_v59 = vsel %vm1616_vm8, %v1497_v26, %v1623_v2  ;;  %v2612_v3 = vpop.f32.mrb[44].mxu0  ;;  %v1704_v56 = vmul.f32 0.0625, %v1631_v50  ;;  %v1638_v7 = vsel %vm1616_vm8, %v1511_v53, %v1637_v9  ;;  %v2615_v12 = vpop.f32.mrb[44].mxu1 }
 0x19c   : > { %v1703_v4 = vmul.f32 0.0625, %v1624_v59  ;;  %v1123_v10 = vrot.slane %v1122_v54, 2  ;;  %v2617_v15 = vpop.f32.mrb[45].mxu0  ;;  %v1705_v55 = vmul.f32 0.0625, %v1638_v7  ;;  %v1137_v62 = vrot.slane %v1136_v60, 2  ;;  %v2622_v14 = vpop.f32.mrb[45].mxu1 }
 0x19d   : > { %1710 = vst [vmem:[%s2619_s19] sm:$0xff] %v1702_v43  ;;  %v1129_v2 = vadd.f32 %v1128_v38, %v1127_v13  ;;  %v1143_v19 = vadd.f32 %v1142_v57, %v1141_v32  ;;  %v2624_v27 = vpop.f32.mrb[46].mxu0  ;;  %1712 = vst [vmem:[%s2619_s19 + $0x10] sm:$0xff] %v1704_v56  ;;  %v976_v28 = vmax.f32 %v2563_v46, 0.0  ;;  %v978_v8 = vmax.f32 %v2566_v29, 0.0  ;;  %v2631_v17 = vpop.f32.mrb[46].mxu1 }
 0x19e   : > { %1711 = vst [vmem:[%s2619_s19 + $0x8] sm:$0xff] %v1703_v4  ;;  %v1124_v9 = vadd.f32 %v1123_v10, %v1122_v54  ;;  %v977_v30 = vmax.f32 %v2568_v48, 0.0  ;;  %v2633_v18 = vpop.f32.mrb[47].mxu0  ;;  %1713 = vst [vmem:[%s2619_s19 + $0x18] sm:$0xff] %v1705_v55  ;;  %v1138_v31 = vadd.f32 %v1137_v62, %v1136_v60  ;;  %v979_v36 = vmax.f32 %v2570_v52, 0.0  ;;  %v2637_v6 = vpop.f32.mrb[47].mxu1 }
 0x19f   : > { %v1130_v1 = vrot.slane %v1129_v2, 2  ;;  %v1144_v35 = vrot.slane %v1143_v19, 2  ;;  %v984_v39 = vmax.f32 %v2572_v37, 0.0  ;;  %v986_v46 = vmax.f32 %v2574_v58, 0.0 }
 0x1a0   : > { %v1125_v0 = vrot.slane %v1124_v9, 1  ;;  %v985_v29 = vmax.f32 %v2576_v49, 0.0  ;;  %v1139_v48 = vrot.slane %v1138_v31, 1  ;;  %v987_v33 = vmax.f32 %v2578_v63, 0.0 }
 0x1a1   : > { %v1131_v5 = vadd.f32 %v1130_v1, %v1129_v2  ;;  %v1145_v40 = vadd.f32 %v1144_v35, %v1143_v19  ;;  %v1176_v23 = vadd.f32 %v984_v39, %v976_v28  ;;  %v1190_v13 = vadd.f32 %v986_v46, %v978_v8 }
 0x1a2   : > { %v2643_v42 = vadd.f32 %v1125_v0, %v1124_v9  ;;  %v1183_v16 = vadd.f32 %v985_v29, %v977_v30  ;;  %v2645_v52 = vadd.f32 %v1139_v48, %v1138_v31  ;;  %v1197_v32 = vadd.f32 %v987_v33, %v979_v36 }
 0x1a3   : > { %v1132_v45 = vrot.slane %v1131_v5, 1  ;;  %v1146_v20 = vrot.slane %v1145_v40, 1  ;;  %v2647_v37 = vpop.f32.mrb[48].mxu0  ;;  %v1177_v58 = vrot.slane %v1176_v23, 4  ;;  %v1191_v51 = vrot.slane %v1190_v13, 4  ;;  %v2650_v44 = vpop.f32.mrb[48].mxu1 }
 0x1a4   : > { %v1184_v49 = vrot.slane %v1183_v16, 4  ;;  %v992_v26 = vmax.f32 %v2587_v24, 0.0  ;;  %v2652_v63 = vpop.f32.mrb[49].mxu0  ;;  %v1198_v53 = vrot.slane %v1197_v32, 4  ;;  %v994_v54 = vmax.f32 %v2591_v25, 0.0  ;;  %v2655_v57 = vpop.f32.mrb[49].mxu1 }
 0x1a5   : > { %v1133_v38 = vadd.f32 %v1132_v45, %v1131_v5  ;;  %v1147_v22 = vadd.f32 %v1146_v20, %v1145_v40  ;;  %v2657_v43 = vpop.f32.mrb[50].mxu0  ;;  %v1178_v50 = vadd.f32 %v1177_v58, %v1176_v23  ;;  %v1192_v59 = vadd.f32 %v1191_v51, %v1190_v13  ;;  %v2660_v4 = vpop.f32.mrb[50].mxu1 }
 0x1a6   : > { %v1185_v60 = vadd.f32 %v1184_v49, %v1183_v16  ;;  %v993_v56 = vmax.f32 %v2593_v34, 0.0  ;;  %v2662_v24 = vpop.f32.mrb[51].mxu0  ;;  %v1199_v7 = vadd.f32 %v1198_v53, %v1197_v32  ;;  %v995_v10 = vmax.f32 %v2597_v61, 0.0  ;;  %v2667_v62 = vpop.f32.mrb[51].mxu1 }
 0x1a7   : > { %v1000_v55 = vmax.f32 %v2599_v21, 0.0  ;;  %v1002_v25 = vmax.f32 %v2602_v11, 0.0  ;;  %v1179_v2 = vrot.slane %v1178_v50, 2  ;;  %v1193_v19 = vrot.slane %v1192_v59, 2 }
 0x1a8   : > { %v1186_v9 = vrot.slane %v1185_v60, 2  ;;  %v1001_v28 = vmax.f32 %v2604_v41, 0.0  ;;  %v1200_v8 = vrot.slane %v1199_v7, 2  ;;  %v1003_v31 = vmax.f32 %v2607_v47, 0.0 }
 0x1a9   : > { %v1232_v34 = vadd.f32 %v1000_v55, %v992_v26  ;;  %v1246_v30 = vadd.f32 %v1002_v25, %v994_v54  ;;  %v1180_v1 = vadd.f32 %v1179_v2, %v1178_v50  ;;  %v1194_v35 = vadd.f32 %v1193_v19, %v1192_v59 }
 0x1aa   : > { %v1187_v36 = vadd.f32 %v1186_v9, %v1185_v60  ;;  %v1239_v61 = vadd.f32 %v1001_v28, %v993_v56  ;;  %v1201_v0 = vadd.f32 %v1200_v8, %v1199_v7  ;;  %v1253_v11 = vadd.f32 %v1003_v31, %v995_v10 }
 0x1ab   : > { %v1233_v21 = vrot.slane %v1232_v34, 4  ;;  %v1247_v39 = vrot.slane %v1246_v30, 4  ;;  %v2671_v46 = vpop.f32.mrb[52].mxu0  ;;  %v1181_v29 = vrot.slane %v1180_v1, 1  ;;  %v1195_v48 = vrot.slane %v1194_v35, 1  ;;  %v2673_v41 = vpop.f32.mrb[52].mxu1 }
 0x1ac   : > { %v1188_v5 = vrot.slane %v1187_v36, 1  ;;  %v1240_v40 = vrot.slane %v1239_v61, 4  ;;  %v2675_v33 = vpop.f32.mrb[53].mxu0  ;;  %v1202_v23 = vrot.slane %v1201_v0, 1  ;;  %v1254_v16 = vrot.slane %v1253_v11, 4  ;;  %v2677_v45 = vpop.f32.mrb[53].mxu1 }
 0x1ad   : > { %v1234_v47 = vadd.f32 %v1233_v21, %v1232_v34  ;;  %v1248_v13 = vadd.f32 %v1247_v39, %v1246_v30  ;;  %v2679_v20 = vpop.f32.mrb[54].mxu0  ;;  %v1182_v32 = vadd.f32 %v1181_v29, %v1180_v1  ;;  %v1196_v58 = vadd.f32 %v1195_v48, %v1194_v35  ;;  %v2681_v26 = vpop.f32.mrb[54].mxu1 }
 0x1ae   : > { %v1189_v51 = vadd.f32 %v1188_v5, %v1187_v36  ;;  %v1241_v49 = vadd.f32 %v1240_v40, %v1239_v61  ;;  %v2683_v53 = vpop.f32.mrb[55].mxu0  ;;  %v1203_v54 = vadd.f32 %v1202_v23, %v1201_v0  ;;  %v1255_v60 = vadd.f32 %v1254_v16, %v1253_v11  ;;  %v2685_v56 = vpop.f32.mrb[55].mxu1 }
 0x1af   : > { %v1235_v50 = vrot.slane %v1234_v47, 2  ;;  %v1249_v59 = vrot.slane %v1248_v13, 2  ;;  %v1639_v7 = vsel %vm1604_vm2, %v1182_v32, %v2643_v42  ;;  %v1653_v10 = vsel %vm1604_vm2, %v1196_v58, %v2645_v52 }
 0x1b0   : > { %v1646_v55 = vsel %vm1604_vm2, %v1189_v51, %v1133_v38  ;;  %v1242_v25 = vrot.slane %v1241_v49, 2  ;;  %v1660_v2 = vsel %vm1604_vm2, %v1203_v54, %v1147_v22  ;;  %v1256_v28 = vrot.slane %v1255_v60, 2 }
 0x1b1   : > { %v1236_v19 = vadd.f32 %v1235_v50, %v1234_v47  ;;  %v1250_v9 = vadd.f32 %v1249_v59, %v1248_v13  ;;  %v1008_v34 = vmax.f32 %v2612_v3, 0.0  ;;  %v1010_v30 = vmax.f32 %v2615_v12, 0.0 }
 0x1b2   : > { %v1243_v8 = vadd.f32 %v1242_v25, %v1241_v49  ;;  %v1009_v31 = vmax.f32 %v2617_v15, 0.0  ;;  %v1257_v35 = vadd.f32 %v1256_v28, %v1255_v60  ;;  %v1011_v52 = vmax.f32 %v2622_v14, 0.0 }
 0x1b3   : > { %v1237_v1 = vrot.slane %v1236_v19, 1  ;;  %v1251_v42 = vrot.slane %v1250_v9, 1  ;;  %v2697_v36 = vpop.f32.mrb[56].mxu0  ;;  %v1016_v22 = vmax.f32 %v2624_v27, 0.0  ;;  %v1018_v61 = vmax.f32 %v2631_v17, 0.0  ;;  %v2702_v21 = vpop.f32.mrb[56].mxu1 }
 0x1b4   : > { %v1244_v38 = vrot.slane %v1243_v8, 1  ;;  %v1017_v0 = vmax.f32 %v2633_v18, 0.0  ;;  %v2704_v3 = vpop.f32.mrb[57].mxu0  ;;  %v1258_v39 = vrot.slane %v1257_v35, 1  ;;  %v1019_v11 = vmax.f32 %v2637_v6, 0.0  ;;  %v2707_v29 = vpop.f32.mrb[57].mxu1 }
 0x1b5   : > { %v1238_v12 = vadd.f32 %v1237_v1, %v1236_v19  ;;  %v1252_v15 = vadd.f32 %v1251_v42, %v1250_v9  ;;  %v2709_v14 = vpop.f32.mrb[58].mxu0  ;;  %v1288_v5 = vadd.f32 %v1016_v22, %v1008_v34  ;;  %v1302_v27 = vadd.f32 %v1018_v61, %v1010_v30  ;;  %v2711_v17 = vpop.f32.mrb[58].mxu1 }
 0x1b6   : > { %v1245_v48 = vadd.f32 %v1244_v38, %v1243_v8  ;;  %v1295_v40 = vadd.f32 %v1017_v0, %v1009_v31  ;;  %v2713_v18 = vpop.f32.mrb[59].mxu0  ;;  %v1259_v13 = vadd.f32 %v1258_v39, %v1257_v35  ;;  %v1309_v16 = vadd.f32 %v1019_v11, %v1011_v52  ;;  %v2717_v32 = vpop.f32.mrb[59].mxu1 }
 0x1b7   : > { %v1640_v23 = vsel %vm1606_vm3, %v1238_v12, %v1639_v7  ;;  %v1654_v47 = vsel %vm1606_vm3, %v1252_v15, %v1653_v10  ;;  %v1289_v58 = vrot.slane %v1288_v5, 4  ;;  %v1303_v51 = vrot.slane %v1302_v27, 4 }
 0x1b8   : > { %v1647_v6 = vsel %vm1606_vm3, %v1245_v48, %v1646_v55  ;;  %v1296_v49 = vrot.slane %v1295_v40, 4  ;;  %v1661_v54 = vsel %vm1606_vm3, %v1259_v13, %v1660_v2  ;;  %v1310_v50 = vrot.slane %v1309_v16, 4 }
 0x1b9   : > { %v1024_v59 = vmax.f32 %v2647_v37, 0.0  ;;  %v1026_v60 = vmax.f32 %v2650_v44, 0.0  ;;  %v1290_v25 = vadd.f32 %v1289_v58, %v1288_v5  ;;  %v1304_v7 = vadd.f32 %v1303_v51, %v1302_v27 }
 0x1ba   : > { %v1297_v19 = vadd.f32 %v1296_v49, %v1295_v40  ;;  %v1025_v10 = vmax.f32 %v2652_v63, 0.0  ;;  %v1311_v9 = vadd.f32 %v1310_v50, %v1309_v16  ;;  %v1027_v28 = vmax.f32 %v2655_v57, 0.0 }
 0x1bb   : > { %v1032_v55 = vmax.f32 %v2657_v43, 0.0  ;;  %v1034_v8 = vmax.f32 %v2660_v4, 0.0  ;;  %v2727_v34 = vpop.f32.mrb[60].mxu0  ;;  %v1291_v2 = vrot.slane %v1290_v25, 2  ;;  %v1305_v30 = vrot.slane %v1304_v7, 2  ;;  %v2730_v44 = vpop.f32.mrb[60].mxu1 }
 0x1bc   : > { %v1298_v31 = vrot.slane %v1297_v19, 2  ;;  %v1033_v37 = vmax.f32 %v2662_v24, 0.0  ;;  %v2732_v1 = vpop.f32.mrb[61].mxu0  ;;  %v1312_v42 = vrot.slane %v1311_v9, 2  ;;  %v1035_v57 = vmax.f32 %v2667_v62, 0.0  ;;  %v2735_v52 = vpop.f32.mrb[61].mxu1 }
 0x1bd   : > { %v1344_v63 = vadd.f32 %v1032_v55, %v1024_v59  ;;  %v1358_v35 = vadd.f32 %v1034_v8, %v1026_v60  ;;  %v2737_v43 = vpop.f32.mrb[62].mxu0  ;;  %v1292_v4 = vadd.f32 %v1291_v2, %v1290_v25  ;;  %v1306_v38 = vadd.f32 %v1305_v30, %v1304_v7  ;;  %v2739_v0 = vpop.f32.mrb[62].mxu1 }
 0x1be   : > { %v1299_v22 = vadd.f32 %v1298_v31, %v1297_v19  ;;  %v1351_v61 = vadd.f32 %v1033_v37, %v1025_v10  ;;  %v2741_v24 = vpop.f32.mrb[63].mxu0  ;;  %v1313_v12 = vadd.f32 %v1312_v42, %v1311_v9  ;;  %v1365_v11 = vadd.f32 %v1035_v57, %v1027_v28  ;;  %v2743_v48 = vpop.f32.mrb[63].mxu1 }
 0x1bf   : > { %v1345_v15 = vrot.slane %v1344_v63, 4  ;;  %v1359_v39 = vrot.slane %v1358_v35, 4  ;;  %v1293_v5 = vrot.slane %v1292_v4, 1  ;;  %v1307_v62 = vrot.slane %v1306_v38, 1 }
 0x1c0   : > { %v1300_v27 = vrot.slane %v1299_v22, 1  ;;  %v1352_v40 = vrot.slane %v1351_v61, 4  ;;  %v1314_v13 = vrot.slane %v1313_v12, 1  ;;  %v1366_v51 = vrot.slane %v1365_v11, 4 }
 0x1c1   : > { %v1346_v16 = vadd.f32 %v1345_v15, %v1344_v63  ;;  %v1360_v58 = vadd.f32 %v1359_v39, %v1358_v35  ;;  %v1294_v49 = vadd.f32 %v1293_v5, %v1292_v4  ;;  %v1308_v50 = vadd.f32 %v1307_v62, %v1306_v38 }
 0x1c2   : > { %v1301_v59 = vadd.f32 %v1300_v27, %v1299_v22  ;;  %v1353_v60 = vadd.f32 %v1352_v40, %v1351_v61  ;;  %v1315_v25 = vadd.f32 %v1314_v13, %v1313_v12  ;;  %v1367_v10 = vadd.f32 %v1366_v51, %v1365_v11 }
 0x1c3   : > { %v1347_v7 = vrot.slane %v1346_v16, 2  ;;  %v1361_v19 = vrot.slane %v1360_v58, 2  ;;  %v1641_v9 = vsel %vm1608_vm4, %v1294_v49, %v1640_v23  ;;  %v1655_v28 = vsel %vm1608_vm4, %v1308_v50, %v1654_v47 }
 0x1c4   : > { %v1648_v55 = vsel %vm1608_vm4, %v1301_v59, %v1647_v6  ;;  %v1354_v8 = vrot.slane %v1353_v60, 2  ;;  %v1662_v2 = vsel %vm1608_vm4, %v1315_v25, %v1661_v54  ;;  %v1368_v37 = vrot.slane %v1367_v10, 2 }
 0x1c5   : > { %v1348_v30 = vadd.f32 %v1347_v7, %v1346_v16  ;;  %v1362_v31 = vadd.f32 %v1361_v19, %v1360_v58  ;;  %v1040_v63 = vmax.f32 %v2671_v46, 0.0  ;;  %v1042_v35 = vmax.f32 %v2673_v41, 0.0 }
 0x1c6   : > { %v1355_v42 = vadd.f32 %v1354_v8, %v1353_v60  ;;  %v1041_v57 = vmax.f32 %v2675_v33, 0.0  ;;  %v1369_v23 = vadd.f32 %v1368_v37, %v1367_v10  ;;  %v1043_v47 = vmax.f32 %v2677_v45, 0.0 }
 0x1c7   : > { %v1349_v4 = vrot.slane %v1348_v30, 1  ;;  %v1363_v38 = vrot.slane %v1362_v31, 1  ;;  %v1048_v6 = vmax.f32 %v2679_v20, 0.0  ;;  %v1050_v54 = vmax.f32 %v2681_v26, 0.0 }
 0x1c8   : > { %v1356_v22 = vrot.slane %v1355_v42, 1  ;;  %v1049_v61 = vmax.f32 %v2683_v53, 0.0  ;;  %v1370_v39 = vrot.slane %v1369_v23, 1  ;;  %v1051_v46 = vmax.f32 %v2685_v56, 0.0 }
 0x1c9   : > { %v1350_v12 = vadd.f32 %v1349_v4, %v1348_v30  ;;  %v1364_v15 = vadd.f32 %v1363_v38, %v1362_v31  ;;  %v1400_v11 = vadd.f32 %v1048_v6, %v1040_v63  ;;  %v1414_v33 = vadd.f32 %v1050_v54, %v1042_v35 }
 0x1ca   : > { %v1357_v41 = vadd.f32 %v1356_v22, %v1355_v42  ;;  %v1407_v5 = vadd.f32 %v1049_v61, %v1041_v57  ;;  %v1371_v27 = vadd.f32 %v1370_v39, %v1369_v23  ;;  %v1421_v40 = vadd.f32 %v1051_v46, %v1043_v47 }
 0x1cb   : > { %v1642_v62 = vsel %vm1610_vm5, %v1350_v12, %v1641_v9  ;;  %v1656_v45 = vsel %vm1610_vm5, %v1364_v15, %v1655_v28  ;;  %v1401_v26 = vrot.slane %v1400_v11, 4  ;;  %v1415_v13 = vrot.slane %v1414_v33, 4 }
 0x1cc   : > { %v1649_v20 = vsel %vm1610_vm5, %v1357_v41, %v1648_v55  ;;  %v1408_v53 = vrot.slane %v1407_v5, 4  ;;  %v1663_v16 = vsel %vm1610_vm5, %v1371_v27, %v1662_v2  ;;  %v1422_v58 = vrot.slane %v1421_v40, 4 }
 0x1cd   : > { %v1056_v56 = vmax.f32 %v2697_v36, 0.0  ;;  %v1058_v51 = vmax.f32 %v2702_v21, 0.0  ;;  %v1402_v49 = vadd.f32 %v1401_v26, %v1400_v11  ;;  %v1416_v50 = vadd.f32 %v1415_v13, %v1414_v33 }
 0x1ce   : > { %v1409_v59 = vadd.f32 %v1408_v53, %v1407_v5  ;;  %v1057_v60 = vmax.f32 %v2704_v3, 0.0  ;;  %v1423_v25 = vadd.f32 %v1422_v58, %v1421_v40  ;;  %v1059_v7 = vmax.f32 %v2707_v29, 0.0 }
 0x1cf   : > { %v1064_v19 = vmax.f32 %v2709_v14, 0.0  ;;  %v1066_v10 = vmax.f32 %v2711_v17, 0.0  ;;  %v1403_v9 = vrot.slane %v1402_v49, 2  ;;  %v1417_v28 = vrot.slane %v1416_v50, 2 }
 0x1d0   : > { %v1410_v55 = vrot.slane %v1409_v59, 2  ;;  %v1065_v8 = vmax.f32 %v2713_v18, 0.0  ;;  %v1424_v36 = vrot.slane %v1423_v25, 2  ;;  %v1067_v30 = vmax.f32 %v2717_v32, 0.0 }
 0x1d1   : > { %v1456_v2 = vadd.f32 %v1064_v19, %v1056_v56  ;;  %v1470_v21 = vadd.f32 %v1066_v10, %v1058_v51  ;;  %v1404_v31 = vadd.f32 %v1403_v9, %v1402_v49  ;;  %v1418_v37 = vadd.f32 %v1417_v28, %v1416_v50 }
 0x1d2   : > { %v1411_v3 = vadd.f32 %v1410_v55, %v1409_v59  ;;  %v1463_v42 = vadd.f32 %v1065_v8, %v1057_v60  ;;  %v1425_v63 = vadd.f32 %v1424_v36, %v1423_v25  ;;  %v1477_v14 = vadd.f32 %v1067_v30, %v1059_v7 }
 0x1d3   : > { %v1457_v29 = vrot.slane %v1456_v2, 4  ;;  %v1471_v35 = vrot.slane %v1470_v21, 4  ;;  %v1405_v57 = vrot.slane %v1404_v31, 1  ;;  %v1419_v17 = vrot.slane %v1418_v37, 1 }
 0x1d4   : > { %v1412_v4 = vrot.slane %v1411_v3, 1  ;;  %v1464_v38 = vrot.slane %v1463_v42, 4  ;;  %v1426_v23 = vrot.slane %v1425_v63, 1  ;;  %v1478_v22 = vrot.slane %v1477_v14, 4 }
 0x1d5   : > { %v1458_v47 = vadd.f32 %v1457_v29, %v1456_v2  ;;  %v1472_v18 = vadd.f32 %v1471_v35, %v1470_v21  ;;  %v1406_v6 = vadd.f32 %v1405_v57, %v1404_v31  ;;  %v1420_v54 = vadd.f32 %v1419_v17, %v1418_v37 }
 0x1d6   : > { %v1413_v61 = vadd.f32 %v1412_v4, %v1411_v3  ;;  %v1465_v32 = vadd.f32 %v1464_v38, %v1463_v42  ;;  %v1427_v12 = vadd.f32 %v1426_v23, %v1425_v63  ;;  %v1479_v46 = vadd.f32 %v1478_v22, %v1477_v14 }
 0x1d7   : > { %v1459_v15 = vrot.slane %v1458_v47, 2  ;;  %v1473_v39 = vrot.slane %v1472_v18, 2  ;;  %v1643_v41 = vsel %vm1612_vm6, %v1406_v6, %v1642_v62  ;;  %v1657_v11 = vsel %vm1612_vm6, %v1420_v54, %v1656_v45 }
 0x1d8   : > { %v1650_v33 = vsel %vm1612_vm6, %v1413_v61, %v1649_v20  ;;  %v1466_v5 = vrot.slane %v1465_v32, 2  ;;  %v1664_v27 = vsel %vm1612_vm6, %v1427_v12, %v1663_v16  ;;  %v1480_v13 = vrot.slane %v1479_v46, 2 }
 0x1d9   : > { %v1460_v40 = vadd.f32 %v1459_v15, %v1458_v47  ;;  %v1474_v26 = vadd.f32 %v1473_v39, %v1472_v18  ;;  %v1072_v58 = vmax.f32 %v2727_v34, 0.0  ;;  %v1074_v56 = vmax.f32 %v2730_v44, 0.0 }
 0x1da   : > { %v1467_v53 = vadd.f32 %v1466_v5, %v1465_v32  ;;  %v1073_v51 = vmax.f32 %v2732_v1, 0.0  ;;  %v1481_v62 = vadd.f32 %v1480_v13, %v1479_v46  ;;  %v1075_v45 = vmax.f32 %v2735_v52, 0.0 }
 0x1db   : > { %v1461_v49 = vrot.slane %v1460_v40, 1  ;;  %v1475_v50 = vrot.slane %v1474_v26, 1  ;;  %v1080_v20 = vmax.f32 %v2737_v43, 0.0  ;;  %v1082_v16 = vmax.f32 %v2739_v0, 0.0 }
 0x1dc   : > { %v1468_v59 = vrot.slane %v1467_v53, 1  ;;  %v1081_v60 = vmax.f32 %v2741_v24, 0.0  ;;  %v1482_v19 = vrot.slane %v1481_v62, 1  ;;  %v1083_v34 = vmax.f32 %v2743_v48, 0.0 }
 0x1dd   : > { %v1462_v25 = vadd.f32 %v1461_v49, %v1460_v40  ;;  %v1476_v7 = vadd.f32 %v1475_v50, %v1474_v26  ;;  %v1512_v10 = vadd.f32 %v1080_v20, %v1072_v58  ;;  %v1526_v1 = vadd.f32 %v1082_v16, %v1074_v56 }
 0x1de   : > { %v1469_v44 = vadd.f32 %v1468_v59, %v1467_v53  ;;  %v1519_v9 = vadd.f32 %v1081_v60, %v1073_v51  ;;  %v1483_v55 = vadd.f32 %v1482_v19, %v1481_v62  ;;  %v1533_v8 = vadd.f32 %v1083_v34, %v1075_v45 }
 0x1df   : > { %v1644_v28 = vsel %vm1614_vm7, %v1462_v25, %v1643_v41  ;;  %v1658_v52 = vsel %vm1614_vm7, %v1476_v7, %v1657_v11  ;;  %v1513_v0 = vrot.slane %v1512_v10, 4  ;;  %v1527_v36 = vrot.slane %v1526_v1, 4 }
 0x1e0   : > { %v1651_v43 = vsel %vm1614_vm7, %v1469_v44, %v1650_v33  ;;  %v1520_v24 = vrot.slane %v1519_v9, 4  ;;  %v1665_v2 = vsel %vm1614_vm7, %v1483_v55, %v1664_v27  ;;  %v1534_v21 = vrot.slane %v1533_v8, 4 }
 0x1e1   : > { %v1514_v30 = vadd.f32 %v1513_v0, %v1512_v10  ;;  %v1528_v48 = vadd.f32 %v1527_v36, %v1526_v1 }
 0x1e2   : > { %v1521_v31 = vadd.f32 %v1520_v24, %v1519_v9  ;;  %v1535_v37 = vadd.f32 %v1534_v21, %v1533_v8 }
 0x1e3   : > { %v1515_v3 = vrot.slane %v1514_v30, 2  ;;  %v1529_v42 = vrot.slane %v1528_v48, 2 }
 0x1e4   : > { %v1522_v63 = vrot.slane %v1521_v31, 2  ;;  %v1536_v29 = vrot.slane %v1535_v37, 2 }
 0x1e5   : > { %v1516_v35 = vadd.f32 %v1515_v3, %v1514_v30  ;;  %v1530_v14 = vadd.f32 %v1529_v42, %v1528_v48 }
 0x1e6   : > { %v1523_v57 = vadd.f32 %v1522_v63, %v1521_v31  ;;  %v1537_v17 = vadd.f32 %v1536_v29, %v1535_v37 }
 0x1e7   : > { %v1517_v4 = vrot.slane %v1516_v35, 1  ;;  %v1531_v38 = vrot.slane %v1530_v14, 1 }
 0x1e8   : > { %v1524_v23 = vrot.slane %v1523_v57, 1  ;;  %v1538_v47 = vrot.slane %v1537_v17, 1 }
 0x1e9   : > { %v1518_v18 = vadd.f32 %v1517_v4, %v1516_v35  ;;  %v1532_v22 = vadd.f32 %v1531_v38, %v1530_v14 }
 0x1ea   : > { %v1525_v6 = vadd.f32 %v1524_v23, %v1523_v57  ;;  %v1539_v54 = vadd.f32 %v1538_v47, %v1537_v17 }
 0x1eb   : > { %v1645_v61 = vsel %vm1616_vm8, %v1518_v18, %v1644_v28  ;;  %v1659_v32 = vsel %vm1616_vm8, %v1532_v22, %v1658_v52 }
 0x1ec   : > { %v1652_v12 = vsel %vm1616_vm8, %v1525_v6, %v1651_v43  ;;  %v1706_v15 = vmul.f32 0.0625, %v1645_v61  ;;  %v1708_v39 = vmul.f32 0.0625, %v1659_v32  ;;  %v1666_v41 = vsel %vm1616_vm8, %v1539_v54, %v1665_v2 }
 0x1ed   : > { %v1707_v46 = vmul.f32 0.0625, %v1652_v12  ;;  %v1709_v11 = vmul.f32 0.0625, %v1666_v41 }
 0x1ee   : > { %1714 = vst [vmem:[%s2619_s19 + $0x20] sm:$0xff] %v1706_v15  ;;  %1716 = vst [vmem:[%s2619_s19 + $0x30] sm:$0xff] %v1708_v39 }
 0x1ef   : > { %1715 = vst [vmem:[%s2619_s19 + $0x28] sm:$0xff] %v1707_v46  ;;  %1717 = vst [vmem:[%s2619_s19 + $0x38] sm:$0xff] %v1709_v11 }
 0x1f0   : > { %2093 = shalt.err (!%p2090_p6)
}
 0x1f1   : > { %s2094_s24 = scalar_lea.hbm %s2794_s8, 1024  ;;  %s2098_s18 = scalar_lea.hbm %s2849_s2, 2048 }
 0x1f2   : > { %p2095_p0 = scmp.ne.s32.totalorder %s2794_s8, %s2094_s24  ;;  %p2099_p12 = scmp.lt.u32.totalorder %s2794_s8, %s2849_s2 }
 0x1f3   : > { %p2100_p5 = scmp.lt.u32.totalorder %s2098_s18, %s2094_s24  ;;  %p2102_p9 = scmp.lt.u32.totalorder %s2094_s24, %s2794_s8 }
 0x1f4   : > { %p2096_p2 = pnand %p2095_p0, %p2868_p11 }
 0x1f5   : > { %p2101_p8 = por %p2100_p5, %p2099_p12 }
 0x1f6   : > { %p2097_p7 = pneg %p2096_p2 }
 0x1f7   : > { %p2103_p13 = por %p2102_p9, %p2101_p8 }
 0x1f9   : > { %p2104_p4 = pnand %p2103_p13, %p2097_p7 }
 0x1fb   : > { %2107 = shalt.err (!%p2104_p4)
}
 0x1fc   : > { %1933 = dma.vmem_to_hbm [thread:$0]  (%p2868_p11), %s2796_s26, 1024, %s2794_s8, %s1719_s12  }
 0x1fd PF: > { %s1747_s3 = sand.u32 1, %s2146_s9   ;;  %p2869_p1 = scmp.ne.s32.totalorder %s2860_s21, 0 }
 0x1fe   : > { %p2870_p10 = scmp.ge.s32.totalorder %s2166_s14, 2  ;;  %s1748_s17 = scalar_lea.sflag [#allocation5], %s1747_s3 }
 0x200   : > { %p1944_p3 = pnand %p2870_p10, %p2869_p1 }
 0x202   : > { %2141 = dma.done.wait (!%p1944_p3), %s1748_s17, 1024  }
 0x203   : > { %2143 = vsyncadd (!%p1944_p3), %s1748_s17, 4294966272  ;;  %s19_s14 = sadd.s32 1, %s2166_s14   ;;  %s2871_s9 = smov %s2150_s10 }
 0x204   : > { %p16_p6 = scmp.ge.s32.totalorder %s19_s14, 4   ;;  %s2872_s10 = smov %s2154_s11 }
 0x205   : > { %s2873_s11 = smov %s2310_s7  ;;  %s2874_s12 = smov %s2162_s13 }
 0x206   : > { %s2875_s13 = smov %s2877_s27  ;;  %18 = sbr.rel (!%p16_p6) target bundleno = 7 (0x7), region = 87 }
 0x20d   :  { %1753 = vsyncpa [#allocation4], 1 }
 0x20e   :  { %1755 = vsyncpa [#allocation4 + $0x1], 1 }
 0x20f   :  { %1756 = vsyncpa [#allocation7], 1 }
 0x210   :  { %1758 = vsyncpa [#allocation7 + $0x1], 1 }
 0x211   :  { %1759 = vsyncpa [#allocation5], 1 }
 0x212   :  { %1761 = vsyncpa [#allocation5 + $0x1], 1 }

</bundles_post_ra>
